<compile_context>
chip_gen: v5e
topology: v5e:2x2
jax: 0.10.0
libtpu: 0.0.40
codegen_flags: <defaults>
</compile_context>

<pallas_src>
import jax
import jax.numpy as jnp
from jax.experimental import pallas as pl
from jax.experimental.pallas import tpu as pltpu

D_MODEL = 32
N_HEADS = 4
D_HEAD = D_MODEL // N_HEADS
D_FF = 64
EPS = 1e-5
NEG_INF = -1e9
N_PROJ = 6 * N_HEADS          # (self q,k,v + cross q,k,v) x heads


# ---------------------------------------------------------------------------
# in-kernel helpers (traced inside the Pallas kernel body)
# ---------------------------------------------------------------------------
def _layernorm(x, gamma, beta):
    # x: (M, D); gamma/beta: (1, D)
    mu = jnp.mean(x, axis=-1, keepdims=True)
    var = jnp.mean((x - mu) ** 2, axis=-1, keepdims=True)
    return (x - mu) * jax.lax.rsqrt(var + EPS) * gamma + beta


def _attend(h_q, h_kv, mask, pw_ref, pb_ref, wo_ref, proj_base, wo_base):
    """Multi-head attention with per-head parameters on the leading axis.

    h_q : (S_q, D)  normed query-side activations
    h_kv: (S_k, D)  key/value-side activations (raw memory for cross-attn)
    mask: (S_q, S_k) {0,1} attend mask
    pw_ref: (N_PROJ, D, D_HEAD) per-head projection weights
    pb_ref: (N_PROJ, 1, D_HEAD) per-head projection biases
    wo_ref: (2*N_HEADS, D_HEAD, D) per-head output-projection row blocks

    All per-head selection is static leading-axis indexing (cheap sublane
    address offsets) — no sub-128-lane slicing of activations.
    """
    scale = 1.0 / float(D_HEAD) ** 0.5
    out = jnp.zeros((h_q.shape[0], D_MODEL), dtype=jnp.float32)
    for h in range(N_HEADS):                                  # tiny static unroll
        iq = proj_base + h
        ik = proj_base + N_HEADS + h
        iv = proj_base + 2 * N_HEADS + h
        qh = jnp.dot(h_q, pw_ref[iq], preferred_element_type=jnp.float32) + pb_ref[iq]
        kh = jnp.dot(h_kv, pw_ref[ik], preferred_element_type=jnp.float32) + pb_ref[ik]
        vh = jnp.dot(h_kv, pw_ref[iv], preferred_element_type=jnp.float32) + pb_ref[iv]
        s = jax.lax.dot_general(qh, kh, (((1,), (1,)), ((), ())),
                                preferred_element_type=jnp.float32) * scale
        s = jnp.where(mask > 0, s, jnp.float32(NEG_INF))       # mask: one select
        s = s - jnp.max(s, axis=-1, keepdims=True)
        p = jnp.exp(s)
        p = p * pl.reciprocal(jnp.sum(p, axis=-1, keepdims=True), approx=True)
        ctx = jnp.dot(p, vh, preferred_element_type=jnp.float32)          # (S_q, dh)
        out = out + jnp.dot(ctx, wo_ref[wo_base + h],
                            preferred_element_type=jnp.float32)           # (S_q, D)
    return out


# ---------------------------------------------------------------------------
# Pallas kernel: one batch element per grid step
# ---------------------------------------------------------------------------
def decoder_layer_kernel(x_ref, mem_ref, tmask_ref, smask_ref,
                         pw_ref, pb_ref, wo_ref,
                         ff_w1_ref, ff_b1_ref, ff_w2_ref, b32_ref, out_ref):
    x = x_ref[...]            # (S, D)
    mem = mem_ref[...]        # (S_mem, D)
    tmask = tmask_ref[...]    # (S, S)      {0,1}
    smask = smask_ref[...]    # (S, S_mem)  {0,1}

    # --- unpack small-vector slab (static sublane slices) ---
    ln1_g = b32_ref[0:1, :]
    ln1_b = b32_ref[1:2, :]
    ln2_g = b32_ref[2:3, :]
    ln2_b = b32_ref[3:4, :]
    ln3_g = b32_ref[4:5, :]
    ln3_b = b32_ref[5:6, :]
    sa_bo = b32_ref[6:7, :]
    ca_bo = b32_ref[7:8, :]
    ff_b2 = b32_ref[8:9, :]

    # --- sublayer 1: masked self-attention (dropout == identity, eval mode) ---
    h1 = _layernorm(x, ln1_g, ln1_b)
    sa = _attend(h1, h1, tmask, pw_ref, pb_ref, wo_ref, 0, 0) + sa_bo
    x1 = x + sa

    # --- sublayer 2: cross-attention (query from norm(x1); K/V from RAW memory
    #     — SublayerConnection only norms args[0]) ---
    h2 = _layernorm(x1, ln2_g, ln2_b)
    ca = _attend(h2, mem, smask, pw_ref, pb_ref, wo_ref,
                 3 * N_HEADS, N_HEADS) + ca_bo
    x2 = x1 + ca

    # --- sublayer 3: position-wise FFN (Linear -> ReLU -> Linear) ---
    h3 = _layernorm(x2, ln3_g, ln3_b)
    f = jnp.maximum(
        jnp.dot(h3, ff_w1_ref[...], preferred_element_type=jnp.float32)
        + ff_b1_ref[...], 0.0)
    f = jnp.dot(f, ff_w2_ref[...], preferred_element_type=jnp.float32) + ff_b2
    out_ref[...] = x2 + f
    # TODO(synk): dropout omitted (eval-mode identity); training-mode dropout
    # would need pltpu.prng_seed + pltpu.prng_random_bits masking here.


# ---------------------------------------------------------------------------
# one-time parameter packing (hoisted out of the per-call path)
# ---------------------------------------------------------------------------
def pack_params(p):
    def w_heads(w):   # (D, D) -> [H x (D, dh)]  (output columns per head)
        return [w[:, h * D_HEAD:(h + 1) * D_HEAD] for h in range(N_HEADS)]

    def b_heads(b):   # (1, D) -> [H x (1, dh)]
        return [b[:, h * D_HEAD:(h + 1) * D_HEAD] for h in range(N_HEADS)]

    proj_w = jnp.stack(
        w_heads(p["sa_wq"]) + w_heads(p["sa_wk"]) + w_heads(p["sa_wv"])
        + w_heads(p["ca_wq"]) + w_heads(p["ca_wk"]) + w_heads(p["ca_wv"]),
        axis=0)                                                 # (24, D, dh)
    proj_b = jnp.stack(
        b_heads(p["sa_bq"]) + b_heads(p["sa_bk"]) + b_heads(p["sa_bv"])
        + b_heads(p["ca_bq"]) + b_heads(p["ca_bk"]) + b_heads(p["ca_bv"]),
        axis=0)                                                 # (24, 1, dh)
    wo_heads = jnp.stack(
        [p["sa_wo"][h * D_HEAD:(h + 1) * D_HEAD, :] for h in range(N_HEADS)]
        + [p["ca_wo"][h * D_HEAD:(h + 1) * D_HEAD, :] for h in range(N_HEADS)],
        axis=0)                                                 # (8, dh, D)
    b32 = jnp.concatenate(
        [p["ln1_g"], p["ln1_b"], p["ln2_g"], p["ln2_b"], p["ln3_g"], p["ln3_b"],
         p["sa_bo"], p["ca_bo"], p["ff_b2"]], axis=0)           # (9, D)
    return dict(proj_w=proj_w, proj_b=proj_b, wo_heads=wo_heads,
                ff_w1=p["ff_w1"], ff_b1=p["ff_b1"], ff_w2=p["ff_w2"], b32=b32)


# ---------------------------------------------------------------------------
# wrapper: batched pallas_call with a parallel grid over the batch
# ---------------------------------------------------------------------------
@jax.jit
def decoder_layer(x, memory, tgt_mask, src_mask, packed):
    B, S, D = x.shape
    S_mem = memory.shape[1]

    x_flat = x.reshape(B * S, D)              # free host-side reshape
    mem_flat = memory.reshape(B * S_mem, D)

    grid_spec = pltpu.PrefetchScalarGridSpec(
        num_scalar_prefetch=0,
        grid=(B,),
        in_specs=[
            pl.BlockSpec((S, D_MODEL), lambda b: (b, 0)),            # x rows (batch b)
            pl.BlockSpec((S_mem, D_MODEL), lambda b: (b, 0)),        # memory rows
            pl.BlockSpec((S, S), lambda b: (0, 0)),                  # tgt mask (shared)
            pl.BlockSpec((S, S_mem), lambda b: (0, 0)),              # src mask (shared)
            pl.BlockSpec((N_PROJ, D_MODEL, D_HEAD), lambda b: (0, 0, 0)),
            pl.BlockSpec((N_PROJ, 1, D_HEAD), lambda b: (0, 0, 0)),
            pl.BlockSpec((2 * N_HEADS, D_HEAD, D_MODEL), lambda b: (0, 0, 0)),
            pl.BlockSpec((D_MODEL, D_FF), lambda b: (0, 0)),
            pl.BlockSpec((1, D_FF), lambda b: (0, 0)),
            pl.BlockSpec((D_FF, D_MODEL), lambda b: (0, 0)),
            pl.BlockSpec((9, D_MODEL), lambda b: (0, 0)),
        ],
        out_specs=pl.BlockSpec((S, D_MODEL), lambda b: (b, 0)),
    )

    out_flat = pl.pallas_call(
        decoder_layer_kernel,
        out_shape=jax.ShapeDtypeStruct((B * S, D_MODEL), jnp.float32),
        grid_spec=grid_spec,
        compiler_params=pltpu.CompilerParams(
            dimension_semantics=("parallel",),        # shard batch across TCs (v7x)
            vmem_limit_bytes=32 * 1024 * 1024),       # safe on v5e/v6e/v7x
    )(x_flat, mem_flat, tgt_mask, src_mask,
      packed["proj_w"], packed["proj_b"], packed["wo_heads"],
      packed["ff_w1"], packed["ff_b1"], packed["ff_w2"], packed["b32"])
    return out_flat.reshape(B, S, D)


# ---------------------------------------------------------------------------
# pure-JAX reference (same math, batched) for correctness check
# ---------------------------------------------------------------------------
def _ref_ln(x, g, b):
    mu = jnp.mean(x, -1, keepdims=True)
    var = jnp.mean((x - mu) ** 2, -1, keepdims=True)
    return (x - mu) / jnp.sqrt(var + EPS) * g[0] + b[0]


def _ref_mha(q_in, kv_in, mask, wq, bq, wk, bk, wv, bv, wo, bo):
    B, Sq, D = q_in.shape
    Sk = kv_in.shape[1]
    q = (q_in @ wq + bq[0]).reshape(B, Sq, N_HEADS, D_HEAD)
    k = (kv_in @ wk + bk[0]).reshape(B, Sk, N_HEADS, D_HEAD)
    v = (kv_in @ wv + bv[0]).reshape(B, Sk, N_HEADS, D_HEAD)
    scores = jnp.einsum("bqhd,bkhd->bhqk", q, k) / jnp.sqrt(float(D_HEAD))
    scores = jnp.where(mask[None, None] == 0, -1e9, scores)
    p = jax.nn.softmax(scores, axis=-1)
    ctx = jnp.einsum("bhqk,bkhd->bqhd", p, v).reshape(B, Sq, D)
    return ctx @ wo + bo[0]


def decoder_layer_ref(x, memory, tgt_mask, src_mask, p):
    h = _ref_ln(x, p["ln1_g"], p["ln1_b"])
    x1 = x + _ref_mha(h, h, tgt_mask, p["sa_wq"], p["sa_bq"], p["sa_wk"],
                      p["sa_bk"], p["sa_wv"], p["sa_bv"], p["sa_wo"], p["sa_bo"])
    h2 = _ref_ln(x1, p["ln2_g"], p["ln2_b"])
    x2 = x1 + _ref_mha(h2, memory, src_mask, p["ca_wq"], p["ca_bq"], p["ca_wk"],
                       p["ca_bk"], p["ca_wv"], p["ca_bv"], p["ca_wo"], p["ca_bo"])
    h3 = _ref_ln(x2, p["ln3_g"], p["ln3_b"])
    f = jnp.maximum(h3 @ p["ff_w1"] + p["ff_b1"][0], 0.0) @ p["ff_w2"] + p["ff_b2"][0]
    return x2 + f


# ---------------------------------------------------------------------------
# deterministic parameter init
# ---------------------------------------------------------------------------
def init_params(key):
    names_shapes = [
        ("ln1_g", (1, D_MODEL)), ("ln1_b", (1, D_MODEL)),
        ("sa_wq", (D_MODEL, D_MODEL)), ("sa_bq", (1, D_MODEL)),
        ("sa_wk", (D_MODEL, D_MODEL)), ("sa_bk", (1, D_MODEL)),
        ("sa_wv", (D_MODEL, D_MODEL)), ("sa_bv", (1, D_MODEL)),
        ("sa_wo", (D_MODEL, D_MODEL)), ("sa_bo", (1, D_MODEL)),
        ("ln2_g", (1, D_MODEL)), ("ln2_b", (1, D_MODEL)),
        ("ca_wq", (D_MODEL, D_MODEL)), ("ca_bq", (1, D_MODEL)),
        ("ca_wk", (D_MODEL, D_MODEL)), ("ca_bk", (1, D_MODEL)),
        ("ca_wv", (D_MODEL, D_MODEL)), ("ca_bv", (1, D_MODEL)),
        ("ca_wo", (D_MODEL, D_MODEL)), ("ca_bo", (1, D_MODEL)),
        ("ln3_g", (1, D_MODEL)), ("ln3_b", (1, D_MODEL)),
        ("ff_w1", (D_MODEL, D_FF)), ("ff_b1", (1, D_FF)),
        ("ff_w2", (D_FF, D_MODEL)), ("ff_b2", (1, D_MODEL)),
    ]
    keys = jax.random.split(key, len(names_shapes))
    params = {}
    for (name, shape), k in zip(names_shapes, keys):
        if name.startswith("ln") and name.endswith("_g"):
            params[name] = jnp.ones(shape, jnp.float32) \
                + 0.1 * jax.random.normal(k, shape, jnp.float32)
        elif name.startswith("ln") and name.endswith("_b"):
            params[name] = 0.1 * jax.random.normal(k, shape, jnp.float32)
        else:
            params[name] = 0.05 * jax.random.normal(k, shape, jnp.float32)
    return params


if __name__ == "__main__":
    B, S, S_MEM = 2, 8, 16
    key = jax.random.PRNGKey(0)
    kx, kmem, kp = jax.random.split(key, 3)

    x = jax.random.normal(kx, (B, S, D_MODEL), jnp.float32)
    memory = jax.random.normal(kmem, (B, S_MEM, D_MODEL), jnp.float32)
    # causal target mask, no source mask (all ones)
    tgt_mask = jnp.tril(jnp.ones((S, S), jnp.float32))
    src_mask = jnp.ones((S, S_MEM), jnp.float32)

    params = init_params(kp)
    packed = pack_params(params)          # hoisted: packed ONCE, not per call

    out = decoder_layer(x, memory, tgt_mask, src_mask, packed)
    out = jax.block_until_ready(out)

    ref = decoder_layer_ref(x, memory, tgt_mask, src_mask, params)
    assert out.shape == (B, S, D_MODEL)
    max_err = float(jnp.max(jnp.abs(out - ref)))
    # tolerance relaxed only because the softmax denominator uses the EUP
    # approximate reciprocal (pl.reciprocal(approx=True)).
    assert jnp.allclose(out, ref, atol=5e-3, rtol=5e-3), max_err
    print("KERNEL_OK")
</pallas_src>

<mosaic_0001>
module attributes {stable_mosaic.version = 11 : i64} {
  func.func @decoder_layer_kernel(%arg0: i32, %arg1: memref<8x32xf32, #tpu.memory_space<vmem>>, %arg2: memref<16x32xf32, #tpu.memory_space<vmem>>, %arg3: memref<8x8xf32, #tpu.memory_space<vmem>>, %arg4: memref<8x16xf32, #tpu.memory_space<vmem>>, %arg5: memref<24x32x8xf32, #tpu.memory_space<vmem>>, %arg6: memref<24x1x8xf32, #tpu.memory_space<vmem>>, %arg7: memref<8x8x32xf32, #tpu.memory_space<vmem>>, %arg8: memref<32x64xf32, #tpu.memory_space<vmem>>, %arg9: memref<1x64xf32, #tpu.memory_space<vmem>>, %arg10: memref<64x32xf32, #tpu.memory_space<vmem>>, %arg11: memref<9x32xf32, #tpu.memory_space<vmem>>, %arg12: memref<8x32xf32, #tpu.memory_space<vmem>>) attributes {dimension_semantics = [#tpu.dimension_semantics<parallel>], iteration_bounds = array<i64: 2>, scalar_prefetch = 0 : i64, scratch_operands = 0 : i64, tpu.core_type = #tpu.core_type<tc>, window_params = [{transform_indices = @transform_0, window_bounds = array<i64: 8, 32>}, {transform_indices = @transform_1, window_bounds = array<i64: 16, 32>}, {pipeline_mode = #tpu.pipeline_mode<synchronous>, transform_indices = @transform_2, window_bounds = array<i64: 8, 8>}, {pipeline_mode = #tpu.pipeline_mode<synchronous>, transform_indices = @transform_3, window_bounds = array<i64: 8, 16>}, {pipeline_mode = #tpu.pipeline_mode<synchronous>, transform_indices = @transform_4, window_bounds = array<i64: 24, 32, 8>}, {pipeline_mode = #tpu.pipeline_mode<synchronous>, transform_indices = @transform_5, window_bounds = array<i64: 24, 1, 8>}, {pipeline_mode = #tpu.pipeline_mode<synchronous>, transform_indices = @transform_6, window_bounds = array<i64: 8, 8, 32>}, {pipeline_mode = #tpu.pipeline_mode<synchronous>, transform_indices = @transform_7, window_bounds = array<i64: 32, 64>}, {pipeline_mode = #tpu.pipeline_mode<synchronous>, transform_indices = @transform_8, window_bounds = array<i64: 1, 64>}, {pipeline_mode = #tpu.pipeline_mode<synchronous>, transform_indices = @transform_9, window_bounds = array<i64: 64, 32>}, {pipeline_mode = #tpu.pipeline_mode<synchronous>, transform_indices = @transform_10, window_bounds = array<i64: 9, 32>}, {transform_indices = @transform_11, window_bounds = array<i64: 8, 32>}]} {
    %c0 = arith.constant 0 : index
    %c0_0 = arith.constant 0 : index
    %0 = vector.load %arg1[%c0, %c0_0] : memref<8x32xf32, #tpu.memory_space<vmem>>, vector<8x32xf32>
    %c0_1 = arith.constant 0 : index
    %c0_2 = arith.constant 0 : index
    %1 = vector.load %arg2[%c0_1, %c0_2] : memref<16x32xf32, #tpu.memory_space<vmem>>, vector<16x32xf32>
    %c0_3 = arith.constant 0 : index
    %c0_4 = arith.constant 0 : index
    %2 = vector.load %arg3[%c0_3, %c0_4] : memref<8x8xf32, #tpu.memory_space<vmem>>, vector<8x8xf32>
    %c0_5 = arith.constant 0 : index
    %c0_6 = arith.constant 0 : index
    %3 = vector.load %arg4[%c0_5, %c0_6] : memref<8x16xf32, #tpu.memory_space<vmem>>, vector<8x16xf32>
    %c0_7 = arith.constant 0 : index
    %c0_8 = arith.constant 0 : index
    %4 = vector.load %arg11[%c0_7, %c0_8] : memref<9x32xf32, #tpu.memory_space<vmem>>, vector<1x32xf32>
    %c1 = arith.constant 1 : index
    %c0_9 = arith.constant 0 : index
    %5 = vector.load %arg11[%c1, %c0_9] : memref<9x32xf32, #tpu.memory_space<vmem>>, vector<1x32xf32>
    %c2 = arith.constant 2 : index
    %c0_10 = arith.constant 0 : index
    %6 = vector.load %arg11[%c2, %c0_10] : memref<9x32xf32, #tpu.memory_space<vmem>>, vector<1x32xf32>
    %c3 = arith.constant 3 : index
    %c0_11 = arith.constant 0 : index
    %7 = vector.load %arg11[%c3, %c0_11] : memref<9x32xf32, #tpu.memory_space<vmem>>, vector<1x32xf32>
    %c4 = arith.constant 4 : index
    %c0_12 = arith.constant 0 : index
    %8 = vector.load %arg11[%c4, %c0_12] : memref<9x32xf32, #tpu.memory_space<vmem>>, vector<1x32xf32>
    %c5 = arith.constant 5 : index
    %c0_13 = arith.constant 0 : index
    %9 = vector.load %arg11[%c5, %c0_13] : memref<9x32xf32, #tpu.memory_space<vmem>>, vector<1x32xf32>
    %c6 = arith.constant 6 : index
    %c0_14 = arith.constant 0 : index
    %10 = vector.load %arg11[%c6, %c0_14] : memref<9x32xf32, #tpu.memory_space<vmem>>, vector<1x32xf32>
    %c7 = arith.constant 7 : index
    %c0_15 = arith.constant 0 : index
    %11 = vector.load %arg11[%c7, %c0_15] : memref<9x32xf32, #tpu.memory_space<vmem>>, vector<1x32xf32>
    %c8 = arith.constant 8 : index
    %c0_16 = arith.constant 0 : index
    %12 = vector.load %arg11[%c8, %c0_16] : memref<9x32xf32, #tpu.memory_space<vmem>>, vector<1x32xf32>
    %cst = arith.constant dense<0.000000e+00> : vector<8xf32>
    %13 = vector.multi_reduction <add>, %0, %cst [1] : vector<8x32xf32> to vector<8xf32>
    %14 = vector.shape_cast %13 : vector<8xf32> to vector<8x1xf32>
    %cst_17 = arith.constant 3.200000e+01 : f32
    %15 = vector.broadcast %cst_17 : f32 to vector<8x1xf32>
    %16 = arith.divf %14, %15 : vector<8x1xf32>
    %17 = vector.broadcast %16 : vector<8x1xf32> to vector<8x32xf32>
    %18 = arith.subf %0, %17 : vector<8x32xf32>
    %19 = arith.mulf %18, %18 : vector<8x32xf32>
    %cst_18 = arith.constant dense<0.000000e+00> : vector<8xf32>
    %20 = vector.multi_reduction <add>, %19, %cst_18 [1] : vector<8x32xf32> to vector<8xf32>
    %21 = vector.shape_cast %20 : vector<8xf32> to vector<8x1xf32>
    %cst_19 = arith.constant 3.200000e+01 : f32
    %22 = vector.broadcast %cst_19 : f32 to vector<8x1xf32>
    %23 = arith.divf %21, %22 : vector<8x1xf32>
    %24 = vector.broadcast %16 : vector<8x1xf32> to vector<8x32xf32>
    %25 = arith.subf %0, %24 : vector<8x32xf32>
    %cst_20 = arith.constant 9.99999974E-6 : f32
    %26 = vector.broadcast %cst_20 : f32 to vector<8x1xf32>
    %27 = arith.addf %23, %26 : vector<8x1xf32>
    %28 = math.rsqrt %27 : vector<8x1xf32>
    %29 = vector.broadcast %28 : vector<8x1xf32> to vector<8x32xf32>
    %30 = arith.mulf %25, %29 : vector<8x32xf32>
    %31 = vector.broadcast %4 : vector<1x32xf32> to vector<8x32xf32>
    %32 = arith.mulf %30, %31 : vector<8x32xf32>
    %33 = vector.broadcast %5 : vector<1x32xf32> to vector<8x32xf32>
    %34 = arith.addf %32, %33 : vector<8x32xf32>
    %cst_21 = arith.constant 0.000000e+00 : f32
    %35 = vector.broadcast %cst_21 : f32 to vector<8x32xf32>
    %c0_22 = arith.constant 0 : index
    %c0_23 = arith.constant 0 : index
    %c0_24 = arith.constant 0 : index
    %36 = vector.load %arg5[%c0_22, %c0_23, %c0_24] : memref<24x32x8xf32, #tpu.memory_space<vmem>>, vector<1x32x8xf32>
    %37 = vector.shape_cast %36 : vector<1x32x8xf32> to vector<32x8xf32>
    %cst_25 = arith.constant dense<0.000000e+00> : vector<8x8xf32>
    %38 = tpu.matmul %34, %37, %cst_25 {dimension_numbers = #tpu.dot_dimension_numbers<[1], [0], [0], [1], [0, 0, 1, 1], [], []>} : vector<8x32xf32>, vector<32x8xf32>, vector<8x8xf32> -> vector<8x8xf32>
    %c0_26 = arith.constant 0 : index
    %c0_27 = arith.constant 0 : index
    %c0_28 = arith.constant 0 : index
    %39 = vector.load %arg6[%c0_26, %c0_27, %c0_28] : memref<24x1x8xf32, #tpu.memory_space<vmem>>, vector<1x1x8xf32>
    %40 = vector.shape_cast %39 : vector<1x1x8xf32> to vector<1x8xf32>
    %41 = vector.broadcast %40 : vector<1x8xf32> to vector<8x8xf32>
    %42 = arith.addf %38, %41 : vector<8x8xf32>
    %c4_29 = arith.constant 4 : index
    %c0_30 = arith.constant 0 : index
    %c0_31 = arith.constant 0 : index
    %43 = vector.load %arg5[%c4_29, %c0_30, %c0_31] : memref<24x32x8xf32, #tpu.memory_space<vmem>>, vector<1x32x8xf32>
    %44 = vector.shape_cast %43 : vector<1x32x8xf32> to vector<32x8xf32>
    %cst_32 = arith.constant dense<0.000000e+00> : vector<8x8xf32>
    %45 = tpu.matmul %34, %44, %cst_32 {dimension_numbers = #tpu.dot_dimension_numbers<[1], [0], [0], [1], [0, 0, 1, 1], [], []>} : vector<8x32xf32>, vector<32x8xf32>, vector<8x8xf32> -> vector<8x8xf32>
    %c4_33 = arith.constant 4 : index
    %c0_34 = arith.constant 0 : index
    %c0_35 = arith.constant 0 : index
    %46 = vector.load %arg6[%c4_33, %c0_34, %c0_35] : memref<24x1x8xf32, #tpu.memory_space<vmem>>, vector<1x1x8xf32>
    %47 = vector.shape_cast %46 : vector<1x1x8xf32> to vector<1x8xf32>
    %48 = vector.broadcast %47 : vector<1x8xf32> to vector<8x8xf32>
    %49 = arith.addf %45, %48 : vector<8x8xf32>
    %c8_36 = arith.constant 8 : index
    %c0_37 = arith.constant 0 : index
    %c0_38 = arith.constant 0 : index
    %50 = vector.load %arg5[%c8_36, %c0_37, %c0_38] : memref<24x32x8xf32, #tpu.memory_space<vmem>>, vector<1x32x8xf32>
    %51 = vector.shape_cast %50 : vector<1x32x8xf32> to vector<32x8xf32>
    %cst_39 = arith.constant dense<0.000000e+00> : vector<8x8xf32>
    %52 = tpu.matmul %34, %51, %cst_39 {dimension_numbers = #tpu.dot_dimension_numbers<[1], [0], [0], [1], [0, 0, 1, 1], [], []>} : vector<8x32xf32>, vector<32x8xf32>, vector<8x8xf32> -> vector<8x8xf32>
    %c8_40 = arith.constant 8 : index
    %c0_41 = arith.constant 0 : index
    %c0_42 = arith.constant 0 : index
    %53 = vector.load %arg6[%c8_40, %c0_41, %c0_42] : memref<24x1x8xf32, #tpu.memory_space<vmem>>, vector<1x1x8xf32>
    %54 = vector.shape_cast %53 : vector<1x1x8xf32> to vector<1x8xf32>
    %55 = vector.broadcast %54 : vector<1x8xf32> to vector<8x8xf32>
    %56 = arith.addf %52, %55 : vector<8x8xf32>
    %cst_43 = arith.constant dense<0.000000e+00> : vector<8x8xf32>
    %57 = tpu.matmul %42, %49, %cst_43 {dimension_numbers = #tpu.dot_dimension_numbers<[1], [1], [0], [0], [0, 0, 1, 0], [], []>} : vector<8x8xf32>, vector<8x8xf32>, vector<8x8xf32> -> vector<8x8xf32>
    %cst_44 = arith.constant 0.353553385 : f32
    %58 = vector.broadcast %cst_44 : f32 to vector<8x8xf32>
    %59 = arith.mulf %57, %58 : vector<8x8xf32>
    %cst_45 = arith.constant 0.000000e+00 : f32
    %60 = vector.broadcast %cst_45 : f32 to vector<8x8xf32>
    %61 = arith.cmpf ogt, %2, %60 : vector<8x8xf32>
    %cst_46 = arith.constant -1.000000e+09 : f32
    %62 = vector.broadcast %cst_46 : f32 to vector<8x8xf32>
    %63 = arith.select %61, %59, %62 : vector<8x8xi1>, vector<8x8xf32>
    %cst_47 = arith.constant dense<0xFF800000> : vector<8xf32>
    %64 = vector.multi_reduction <maximumf>, %63, %cst_47 [1] : vector<8x8xf32> to vector<8xf32>
    %65 = vector.shape_cast %64 : vector<8xf32> to vector<8x1xf32>
    %66 = vector.broadcast %65 : vector<8x1xf32> to vector<8x8xf32>
    %67 = arith.subf %63, %66 : vector<8x8xf32>
    %68 = math.exp %67 : vector<8x8xf32>
    %cst_48 = arith.constant dense<0.000000e+00> : vector<8xf32>
    %69 = vector.multi_reduction <add>, %68, %cst_48 [1] : vector<8x8xf32> to vector<8xf32>
    %70 = vector.shape_cast %69 : vector<8xf32> to vector<8x1xf32>
    %71 = tpu.reciprocal %70 {approx = true} : vector<8x1xf32> -> vector<8x1xf32>
    %72 = vector.broadcast %71 : vector<8x1xf32> to vector<8x8xf32>
    %73 = arith.mulf %68, %72 : vector<8x8xf32>
    %cst_49 = arith.constant dense<0.000000e+00> : vector<8x8xf32>
    %74 = tpu.matmul %73, %56, %cst_49 {dimension_numbers = #tpu.dot_dimension_numbers<[1], [0], [0], [1], [0, 0, 1, 1], [], []>} : vector<8x8xf32>, vector<8x8xf32>, vector<8x8xf32> -> vector<8x8xf32>
    %c0_50 = arith.constant 0 : index
    %c0_51 = arith.constant 0 : index
    %c0_52 = arith.constant 0 : index
    %75 = vector.load %arg7[%c0_50, %c0_51, %c0_52] : memref<8x8x32xf32, #tpu.memory_space<vmem>>, vector<1x8x32xf32>
    %76 = vector.shape_cast %75 : vector<1x8x32xf32> to vector<8x32xf32>
    %cst_53 = arith.constant dense<0.000000e+00> : vector<8x32xf32>
    %77 = tpu.matmul %74, %76, %cst_53 {dimension_numbers = #tpu.dot_dimension_numbers<[1], [0], [0], [1], [0, 0, 1, 1], [], []>} : vector<8x8xf32>, vector<8x32xf32>, vector<8x32xf32> -> vector<8x32xf32>
    %78 = arith.addf %35, %77 : vector<8x32xf32>
    %c1_54 = arith.constant 1 : index
    %c0_55 = arith.constant 0 : index
    %c0_56 = arith.constant 0 : index
    %79 = vector.load %arg5[%c1_54, %c0_55, %c0_56] : memref<24x32x8xf32, #tpu.memory_space<vmem>>, vector<1x32x8xf32>
    %80 = vector.shape_cast %79 : vector<1x32x8xf32> to vector<32x8xf32>
    %cst_57 = arith.constant dense<0.000000e+00> : vector<8x8xf32>
    %81 = tpu.matmul %34, %80, %cst_57 {dimension_numbers = #tpu.dot_dimension_numbers<[1], [0], [0], [1], [0, 0, 1, 1], [], []>} : vector<8x32xf32>, vector<32x8xf32>, vector<8x8xf32> -> vector<8x8xf32>
    %c1_58 = arith.constant 1 : index
    %c0_59 = arith.constant 0 : index
    %c0_60 = arith.constant 0 : index
    %82 = vector.load %arg6[%c1_58, %c0_59, %c0_60] : memref<24x1x8xf32, #tpu.memory_space<vmem>>, vector<1x1x8xf32>
    %83 = vector.shape_cast %82 : vector<1x1x8xf32> to vector<1x8xf32>
    %84 = vector.broadcast %83 : vector<1x8xf32> to vector<8x8xf32>
    %85 = arith.addf %81, %84 : vector<8x8xf32>
    %c5_61 = arith.constant 5 : index
    %c0_62 = arith.constant 0 : index
    %c0_63 = arith.constant 0 : index
    %86 = vector.load %arg5[%c5_61, %c0_62, %c0_63] : memref<24x32x8xf32, #tpu.memory_space<vmem>>, vector<1x32x8xf32>
    %87 = vector.shape_cast %86 : vector<1x32x8xf32> to vector<32x8xf32>
    %cst_64 = arith.constant dense<0.000000e+00> : vector<8x8xf32>
    %88 = tpu.matmul %34, %87, %cst_64 {dimension_numbers = #tpu.dot_dimension_numbers<[1], [0], [0], [1], [0, 0, 1, 1], [], []>} : vector<8x32xf32>, vector<32x8xf32>, vector<8x8xf32> -> vector<8x8xf32>
    %c5_65 = arith.constant 5 : index
    %c0_66 = arith.constant 0 : index
    %c0_67 = arith.constant 0 : index
    %89 = vector.load %arg6[%c5_65, %c0_66, %c0_67] : memref<24x1x8xf32, #tpu.memory_space<vmem>>, vector<1x1x8xf32>
    %90 = vector.shape_cast %89 : vector<1x1x8xf32> to vector<1x8xf32>
    %91 = vector.broadcast %90 : vector<1x8xf32> to vector<8x8xf32>
    %92 = arith.addf %88, %91 : vector<8x8xf32>
    %c9 = arith.constant 9 : index
    %c0_68 = arith.constant 0 : index
    %c0_69 = arith.constant 0 : index
    %93 = vector.load %arg5[%c9, %c0_68, %c0_69] : memref<24x32x8xf32, #tpu.memory_space<vmem>>, vector<1x32x8xf32>
    %94 = vector.shape_cast %93 : vector<1x32x8xf32> to vector<32x8xf32>
    %cst_70 = arith.constant dense<0.000000e+00> : vector<8x8xf32>
    %95 = tpu.matmul %34, %94, %cst_70 {dimension_numbers = #tpu.dot_dimension_numbers<[1], [0], [0], [1], [0, 0, 1, 1], [], []>} : vector<8x32xf32>, vector<32x8xf32>, vector<8x8xf32> -> vector<8x8xf32>
    %c9_71 = arith.constant 9 : index
    %c0_72 = arith.constant 0 : index
    %c0_73 = arith.constant 0 : index
    %96 = vector.load %arg6[%c9_71, %c0_72, %c0_73] : memref<24x1x8xf32, #tpu.memory_space<vmem>>, vector<1x1x8xf32>
    %97 = vector.shape_cast %96 : vector<1x1x8xf32> to vector<1x8xf32>
    %98 = vector.broadcast %97 : vector<1x8xf32> to vector<8x8xf32>
    %99 = arith.addf %95, %98 : vector<8x8xf32>
    %cst_74 = arith.constant dense<0.000000e+00> : vector<8x8xf32>
    %100 = tpu.matmul %85, %92, %cst_74 {dimension_numbers = #tpu.dot_dimension_numbers<[1], [1], [0], [0], [0, 0, 1, 0], [], []>} : vector<8x8xf32>, vector<8x8xf32>, vector<8x8xf32> -> vector<8x8xf32>
    %cst_75 = arith.constant 0.353553385 : f32
    %101 = vector.broadcast %cst_75 : f32 to vector<8x8xf32>
    %102 = arith.mulf %100, %101 : vector<8x8xf32>
    %cst_76 = arith.constant 0.000000e+00 : f32
    %103 = vector.broadcast %cst_76 : f32 to vector<8x8xf32>
    %104 = arith.cmpf ogt, %2, %103 : vector<8x8xf32>
    %cst_77 = arith.constant -1.000000e+09 : f32
    %105 = vector.broadcast %cst_77 : f32 to vector<8x8xf32>
    %106 = arith.select %104, %102, %105 : vector<8x8xi1>, vector<8x8xf32>
    %cst_78 = arith.constant dense<0xFF800000> : vector<8xf32>
    %107 = vector.multi_reduction <maximumf>, %106, %cst_78 [1] : vector<8x8xf32> to vector<8xf32>
    %108 = vector.shape_cast %107 : vector<8xf32> to vector<8x1xf32>
    %109 = vector.broadcast %108 : vector<8x1xf32> to vector<8x8xf32>
    %110 = arith.subf %106, %109 : vector<8x8xf32>
    %111 = math.exp %110 : vector<8x8xf32>
    %cst_79 = arith.constant dense<0.000000e+00> : vector<8xf32>
    %112 = vector.multi_reduction <add>, %111, %cst_79 [1] : vector<8x8xf32> to vector<8xf32>
    %113 = vector.shape_cast %112 : vector<8xf32> to vector<8x1xf32>
    %114 = tpu.reciprocal %113 {approx = true} : vector<8x1xf32> -> vector<8x1xf32>
    %115 = vector.broadcast %114 : vector<8x1xf32> to vector<8x8xf32>
    %116 = arith.mulf %111, %115 : vector<8x8xf32>
    %cst_80 = arith.constant dense<0.000000e+00> : vector<8x8xf32>
    %117 = tpu.matmul %116, %99, %cst_80 {dimension_numbers = #tpu.dot_dimension_numbers<[1], [0], [0], [1], [0, 0, 1, 1], [], []>} : vector<8x8xf32>, vector<8x8xf32>, vector<8x8xf32> -> vector<8x8xf32>
    %c1_81 = arith.constant 1 : index
    %c0_82 = arith.constant 0 : index
    %c0_83 = arith.constant 0 : index
    %118 = vector.load %arg7[%c1_81, %c0_82, %c0_83] : memref<8x8x32xf32, #tpu.memory_space<vmem>>, vector<1x8x32xf32>
    %119 = vector.shape_cast %118 : vector<1x8x32xf32> to vector<8x32xf32>
    %cst_84 = arith.constant dense<0.000000e+00> : vector<8x32xf32>
    %120 = tpu.matmul %117, %119, %cst_84 {dimension_numbers = #tpu.dot_dimension_numbers<[1], [0], [0], [1], [0, 0, 1, 1], [], []>} : vector<8x8xf32>, vector<8x32xf32>, vector<8x32xf32> -> vector<8x32xf32>
    %121 = arith.addf %78, %120 : vector<8x32xf32>
    %c2_85 = arith.constant 2 : index
    %c0_86 = arith.constant 0 : index
    %c0_87 = arith.constant 0 : index
    %122 = vector.load %arg5[%c2_85, %c0_86, %c0_87] : memref<24x32x8xf32, #tpu.memory_space<vmem>>, vector<1x32x8xf32>
    %123 = vector.shape_cast %122 : vector<1x32x8xf32> to vector<32x8xf32>
    %cst_88 = arith.constant dense<0.000000e+00> : vector<8x8xf32>
    %124 = tpu.matmul %34, %123, %cst_88 {dimension_numbers = #tpu.dot_dimension_numbers<[1], [0], [0], [1], [0, 0, 1, 1], [], []>} : vector<8x32xf32>, vector<32x8xf32>, vector<8x8xf32> -> vector<8x8xf32>
    %c2_89 = arith.constant 2 : index
    %c0_90 = arith.constant 0 : index
    %c0_91 = arith.constant 0 : index
    %125 = vector.load %arg6[%c2_89, %c0_90, %c0_91] : memref<24x1x8xf32, #tpu.memory_space<vmem>>, vector<1x1x8xf32>
    %126 = vector.shape_cast %125 : vector<1x1x8xf32> to vector<1x8xf32>
    %127 = vector.broadcast %126 : vector<1x8xf32> to vector<8x8xf32>
    %128 = arith.addf %124, %127 : vector<8x8xf32>
    %c6_92 = arith.constant 6 : index
    %c0_93 = arith.constant 0 : index
    %c0_94 = arith.constant 0 : index
    %129 = vector.load %arg5[%c6_92, %c0_93, %c0_94] : memref<24x32x8xf32, #tpu.memory_space<vmem>>, vector<1x32x8xf32>
    %130 = vector.shape_cast %129 : vector<1x32x8xf32> to vector<32x8xf32>
    %cst_95 = arith.constant dense<0.000000e+00> : vector<8x8xf32>
    %131 = tpu.matmul %34, %130, %cst_95 {dimension_numbers = #tpu.dot_dimension_numbers<[1], [0], [0], [1], [0, 0, 1, 1], [], []>} : vector<8x32xf32>, vector<32x8xf32>, vector<8x8xf32> -> vector<8x8xf32>
    %c6_96 = arith.constant 6 : index
    %c0_97 = arith.constant 0 : index
    %c0_98 = arith.constant 0 : index
    %132 = vector.load %arg6[%c6_96, %c0_97, %c0_98] : memref<24x1x8xf32, #tpu.memory_space<vmem>>, vector<1x1x8xf32>
    %133 = vector.shape_cast %132 : vector<1x1x8xf32> to vector<1x8xf32>
    %134 = vector.broadcast %133 : vector<1x8xf32> to vector<8x8xf32>
    %135 = arith.addf %131, %134 : vector<8x8xf32>
    %c10 = arith.constant 10 : index
    %c0_99 = arith.constant 0 : index
    %c0_100 = arith.constant 0 : index
    %136 = vector.load %arg5[%c10, %c0_99, %c0_100] : memref<24x32x8xf32, #tpu.memory_space<vmem>>, vector<1x32x8xf32>
    %137 = vector.shape_cast %136 : vector<1x32x8xf32> to vector<32x8xf32>
    %cst_101 = arith.constant dense<0.000000e+00> : vector<8x8xf32>
    %138 = tpu.matmul %34, %137, %cst_101 {dimension_numbers = #tpu.dot_dimension_numbers<[1], [0], [0], [1], [0, 0, 1, 1], [], []>} : vector<8x32xf32>, vector<32x8xf32>, vector<8x8xf32> -> vector<8x8xf32>
    %c10_102 = arith.constant 10 : index
    %c0_103 = arith.constant 0 : index
    %c0_104 = arith.constant 0 : index
    %139 = vector.load %arg6[%c10_102, %c0_103, %c0_104] : memref<24x1x8xf32, #tpu.memory_space<vmem>>, vector<1x1x8xf32>
    %140 = vector.shape_cast %139 : vector<1x1x8xf32> to vector<1x8xf32>
    %141 = vector.broadcast %140 : vector<1x8xf32> to vector<8x8xf32>
    %142 = arith.addf %138, %141 : vector<8x8xf32>
    %cst_105 = arith.constant dense<0.000000e+00> : vector<8x8xf32>
    %143 = tpu.matmul %128, %135, %cst_105 {dimension_numbers = #tpu.dot_dimension_numbers<[1], [1], [0], [0], [0, 0, 1, 0], [], []>} : vector<8x8xf32>, vector<8x8xf32>, vector<8x8xf32> -> vector<8x8xf32>
    %cst_106 = arith.constant 0.353553385 : f32
    %144 = vector.broadcast %cst_106 : f32 to vector<8x8xf32>
    %145 = arith.mulf %143, %144 : vector<8x8xf32>
    %cst_107 = arith.constant 0.000000e+00 : f32
    %146 = vector.broadcast %cst_107 : f32 to vector<8x8xf32>
    %147 = arith.cmpf ogt, %2, %146 : vector<8x8xf32>
    %cst_108 = arith.constant -1.000000e+09 : f32
    %148 = vector.broadcast %cst_108 : f32 to vector<8x8xf32>
    %149 = arith.select %147, %145, %148 : vector<8x8xi1>, vector<8x8xf32>
    %cst_109 = arith.constant dense<0xFF800000> : vector<8xf32>
    %150 = vector.multi_reduction <maximumf>, %149, %cst_109 [1] : vector<8x8xf32> to vector<8xf32>
    %151 = vector.shape_cast %150 : vector<8xf32> to vector<8x1xf32>
    %152 = vector.broadcast %151 : vector<8x1xf32> to vector<8x8xf32>
    %153 = arith.subf %149, %152 : vector<8x8xf32>
    %154 = math.exp %153 : vector<8x8xf32>
    %cst_110 = arith.constant dense<0.000000e+00> : vector<8xf32>
    %155 = vector.multi_reduction <add>, %154, %cst_110 [1] : vector<8x8xf32> to vector<8xf32>
    %156 = vector.shape_cast %155 : vector<8xf32> to vector<8x1xf32>
    %157 = tpu.reciprocal %156 {approx = true} : vector<8x1xf32> -> vector<8x1xf32>
    %158 = vector.broadcast %157 : vector<8x1xf32> to vector<8x8xf32>
    %159 = arith.mulf %154, %158 : vector<8x8xf32>
    %cst_111 = arith.constant dense<0.000000e+00> : vector<8x8xf32>
    %160 = tpu.matmul %159, %142, %cst_111 {dimension_numbers = #tpu.dot_dimension_numbers<[1], [0], [0], [1], [0, 0, 1, 1], [], []>} : vector<8x8xf32>, vector<8x8xf32>, vector<8x8xf32> -> vector<8x8xf32>
    %c2_112 = arith.constant 2 : index
    %c0_113 = arith.constant 0 : index
    %c0_114 = arith.constant 0 : index
    %161 = vector.load %arg7[%c2_112, %c0_113, %c0_114] : memref<8x8x32xf32, #tpu.memory_space<vmem>>, vector<1x8x32xf32>
    %162 = vector.shape_cast %161 : vector<1x8x32xf32> to vector<8x32xf32>
    %cst_115 = arith.constant dense<0.000000e+00> : vector<8x32xf32>
    %163 = tpu.matmul %160, %162, %cst_115 {dimension_numbers = #tpu.dot_dimension_numbers<[1], [0], [0], [1], [0, 0, 1, 1], [], []>} : vector<8x8xf32>, vector<8x32xf32>, vector<8x32xf32> -> vector<8x32xf32>
    %164 = arith.addf %121, %163 : vector<8x32xf32>
    %c3_116 = arith.constant 3 : index
    %c0_117 = arith.constant 0 : index
    %c0_118 = arith.constant 0 : index
    %165 = vector.load %arg5[%c3_116, %c0_117, %c0_118] : memref<24x32x8xf32, #tpu.memory_space<vmem>>, vector<1x32x8xf32>
    %166 = vector.shape_cast %165 : vector<1x32x8xf32> to vector<32x8xf32>
    %cst_119 = arith.constant dense<0.000000e+00> : vector<8x8xf32>
    %167 = tpu.matmul %34, %166, %cst_119 {dimension_numbers = #tpu.dot_dimension_numbers<[1], [0], [0], [1], [0, 0, 1, 1], [], []>} : vector<8x32xf32>, vector<32x8xf32>, vector<8x8xf32> -> vector<8x8xf32>
    %c3_120 = arith.constant 3 : index
    %c0_121 = arith.constant 0 : index
    %c0_122 = arith.constant 0 : index
    %168 = vector.load %arg6[%c3_120, %c0_121, %c0_122] : memref<24x1x8xf32, #tpu.memory_space<vmem>>, vector<1x1x8xf32>
    %169 = vector.shape_cast %168 : vector<1x1x8xf32> to vector<1x8xf32>
    %170 = vector.broadcast %169 : vector<1x8xf32> to vector<8x8xf32>
    %171 = arith.addf %167, %170 : vector<8x8xf32>
    %c7_123 = arith.constant 7 : index
    %c0_124 = arith.constant 0 : index
    %c0_125 = arith.constant 0 : index
    %172 = vector.load %arg5[%c7_123, %c0_124, %c0_125] : memref<24x32x8xf32, #tpu.memory_space<vmem>>, vector<1x32x8xf32>
    %173 = vector.shape_cast %172 : vector<1x32x8xf32> to vector<32x8xf32>
    %cst_126 = arith.constant dense<0.000000e+00> : vector<8x8xf32>
    %174 = tpu.matmul %34, %173, %cst_126 {dimension_numbers = #tpu.dot_dimension_numbers<[1], [0], [0], [1], [0, 0, 1, 1], [], []>} : vector<8x32xf32>, vector<32x8xf32>, vector<8x8xf32> -> vector<8x8xf32>
    %c7_127 = arith.constant 7 : index
    %c0_128 = arith.constant 0 : index
    %c0_129 = arith.constant 0 : index
    %175 = vector.load %arg6[%c7_127, %c0_128, %c0_129] : memref<24x1x8xf32, #tpu.memory_space<vmem>>, vector<1x1x8xf32>
    %176 = vector.shape_cast %175 : vector<1x1x8xf32> to vector<1x8xf32>
    %177 = vector.broadcast %176 : vector<1x8xf32> to vector<8x8xf32>
    %178 = arith.addf %174, %177 : vector<8x8xf32>
    %c11 = arith.constant 11 : index
    %c0_130 = arith.constant 0 : index
    %c0_131 = arith.constant 0 : index
    %179 = vector.load %arg5[%c11, %c0_130, %c0_131] : memref<24x32x8xf32, #tpu.memory_space<vmem>>, vector<1x32x8xf32>
    %180 = vector.shape_cast %179 : vector<1x32x8xf32> to vector<32x8xf32>
    %cst_132 = arith.constant dense<0.000000e+00> : vector<8x8xf32>
    %181 = tpu.matmul %34, %180, %cst_132 {dimension_numbers = #tpu.dot_dimension_numbers<[1], [0], [0], [1], [0, 0, 1, 1], [], []>} : vector<8x32xf32>, vector<32x8xf32>, vector<8x8xf32> -> vector<8x8xf32>
    %c11_133 = arith.constant 11 : index
    %c0_134 = arith.constant 0 : index
    %c0_135 = arith.constant 0 : index
    %182 = vector.load %arg6[%c11_133, %c0_134, %c0_135] : memref<24x1x8xf32, #tpu.memory_space<vmem>>, vector<1x1x8xf32>
    %183 = vector.shape_cast %182 : vector<1x1x8xf32> to vector<1x8xf32>
    %184 = vector.broadcast %183 : vector<1x8xf32> to vector<8x8xf32>
    %185 = arith.addf %181, %184 : vector<8x8xf32>
    %cst_136 = arith.constant dense<0.000000e+00> : vector<8x8xf32>
    %186 = tpu.matmul %171, %178, %cst_136 {dimension_numbers = #tpu.dot_dimension_numbers<[1], [1], [0], [0], [0, 0, 1, 0], [], []>} : vector<8x8xf32>, vector<8x8xf32>, vector<8x8xf32> -> vector<8x8xf32>
    %cst_137 = arith.constant 0.353553385 : f32
    %187 = vector.broadcast %cst_137 : f32 to vector<8x8xf32>
    %188 = arith.mulf %186, %187 : vector<8x8xf32>
    %cst_138 = arith.constant 0.000000e+00 : f32
    %189 = vector.broadcast %cst_138 : f32 to vector<8x8xf32>
    %190 = arith.cmpf ogt, %2, %189 : vector<8x8xf32>
    %cst_139 = arith.constant -1.000000e+09 : f32
    %191 = vector.broadcast %cst_139 : f32 to vector<8x8xf32>
    %192 = arith.select %190, %188, %191 : vector<8x8xi1>, vector<8x8xf32>
    %cst_140 = arith.constant dense<0xFF800000> : vector<8xf32>
    %193 = vector.multi_reduction <maximumf>, %192, %cst_140 [1] : vector<8x8xf32> to vector<8xf32>
    %194 = vector.shape_cast %193 : vector<8xf32> to vector<8x1xf32>
    %195 = vector.broadcast %194 : vector<8x1xf32> to vector<8x8xf32>
    %196 = arith.subf %192, %195 : vector<8x8xf32>
    %197 = math.exp %196 : vector<8x8xf32>
    %cst_141 = arith.constant dense<0.000000e+00> : vector<8xf32>
    %198 = vector.multi_reduction <add>, %197, %cst_141 [1] : vector<8x8xf32> to vector<8xf32>
    %199 = vector.shape_cast %198 : vector<8xf32> to vector<8x1xf32>
    %200 = tpu.reciprocal %199 {approx = true} : vector<8x1xf32> -> vector<8x1xf32>
    %201 = vector.broadcast %200 : vector<8x1xf32> to vector<8x8xf32>
    %202 = arith.mulf %197, %201 : vector<8x8xf32>
    %cst_142 = arith.constant dense<0.000000e+00> : vector<8x8xf32>
    %203 = tpu.matmul %202, %185, %cst_142 {dimension_numbers = #tpu.dot_dimension_numbers<[1], [0], [0], [1], [0, 0, 1, 1], [], []>} : vector<8x8xf32>, vector<8x8xf32>, vector<8x8xf32> -> vector<8x8xf32>
    %c3_143 = arith.constant 3 : index
    %c0_144 = arith.constant 0 : index
    %c0_145 = arith.constant 0 : index
    %204 = vector.load %arg7[%c3_143, %c0_144, %c0_145] : memref<8x8x32xf32, #tpu.memory_space<vmem>>, vector<1x8x32xf32>
    %205 = vector.shape_cast %204 : vector<1x8x32xf32> to vector<8x32xf32>
    %cst_146 = arith.constant dense<0.000000e+00> : vector<8x32xf32>
    %206 = tpu.matmul %203, %205, %cst_146 {dimension_numbers = #tpu.dot_dimension_numbers<[1], [0], [0], [1], [0, 0, 1, 1], [], []>} : vector<8x8xf32>, vector<8x32xf32>, vector<8x32xf32> -> vector<8x32xf32>
    %207 = arith.addf %164, %206 : vector<8x32xf32>
    %208 = vector.broadcast %10 : vector<1x32xf32> to vector<8x32xf32>
    %209 = arith.addf %207, %208 : vector<8x32xf32>
    %210 = arith.addf %0, %209 : vector<8x32xf32>
    %cst_147 = arith.constant dense<0.000000e+00> : vector<8xf32>
    %211 = vector.multi_reduction <add>, %210, %cst_147 [1] : vector<8x32xf32> to vector<8xf32>
    %212 = vector.shape_cast %211 : vector<8xf32> to vector<8x1xf32>
    %cst_148 = arith.constant 3.200000e+01 : f32
    %213 = vector.broadcast %cst_148 : f32 to vector<8x1xf32>
    %214 = arith.divf %212, %213 : vector<8x1xf32>
    %215 = vector.broadcast %214 : vector<8x1xf32> to vector<8x32xf32>
    %216 = arith.subf %210, %215 : vector<8x32xf32>
    %217 = arith.mulf %216, %216 : vector<8x32xf32>
    %cst_149 = arith.constant dense<0.000000e+00> : vector<8xf32>
    %218 = vector.multi_reduction <add>, %217, %cst_149 [1] : vector<8x32xf32> to vector<8xf32>
    %219 = vector.shape_cast %218 : vector<8xf32> to vector<8x1xf32>
    %cst_150 = arith.constant 3.200000e+01 : f32
    %220 = vector.broadcast %cst_150 : f32 to vector<8x1xf32>
    %221 = arith.divf %219, %220 : vector<8x1xf32>
    %222 = vector.broadcast %214 : vector<8x1xf32> to vector<8x32xf32>
    %223 = arith.subf %210, %222 : vector<8x32xf32>
    %cst_151 = arith.constant 9.99999974E-6 : f32
    %224 = vector.broadcast %cst_151 : f32 to vector<8x1xf32>
    %225 = arith.addf %221, %224 : vector<8x1xf32>
    %226 = math.rsqrt %225 : vector<8x1xf32>
    %227 = vector.broadcast %226 : vector<8x1xf32> to vector<8x32xf32>
    %228 = arith.mulf %223, %227 : vector<8x32xf32>
    %229 = vector.broadcast %6 : vector<1x32xf32> to vector<8x32xf32>
    %230 = arith.mulf %228, %229 : vector<8x32xf32>
    %231 = vector.broadcast %7 : vector<1x32xf32> to vector<8x32xf32>
    %232 = arith.addf %230, %231 : vector<8x32xf32>
    %cst_152 = arith.constant 0.000000e+00 : f32
    %233 = vector.broadcast %cst_152 : f32 to vector<8x32xf32>
    %c12 = arith.constant 12 : index
    %c0_153 = arith.constant 0 : index
    %c0_154 = arith.constant 0 : index
    %234 = vector.load %arg5[%c12, %c0_153, %c0_154] : memref<24x32x8xf32, #tpu.memory_space<vmem>>, vector<1x32x8xf32>
    %235 = vector.shape_cast %234 : vector<1x32x8xf32> to vector<32x8xf32>
    %cst_155 = arith.constant dense<0.000000e+00> : vector<8x8xf32>
    %236 = tpu.matmul %232, %235, %cst_155 {dimension_numbers = #tpu.dot_dimension_numbers<[1], [0], [0], [1], [0, 0, 1, 1], [], []>} : vector<8x32xf32>, vector<32x8xf32>, vector<8x8xf32> -> vector<8x8xf32>
    %c12_156 = arith.constant 12 : index
    %c0_157 = arith.constant 0 : index
    %c0_158 = arith.constant 0 : index
    %237 = vector.load %arg6[%c12_156, %c0_157, %c0_158] : memref<24x1x8xf32, #tpu.memory_space<vmem>>, vector<1x1x8xf32>
    %238 = vector.shape_cast %237 : vector<1x1x8xf32> to vector<1x8xf32>
    %239 = vector.broadcast %238 : vector<1x8xf32> to vector<8x8xf32>
    %240 = arith.addf %236, %239 : vector<8x8xf32>
    %c16 = arith.constant 16 : index
    %c0_159 = arith.constant 0 : index
    %c0_160 = arith.constant 0 : index
    %241 = vector.load %arg5[%c16, %c0_159, %c0_160] : memref<24x32x8xf32, #tpu.memory_space<vmem>>, vector<1x32x8xf32>
    %242 = vector.shape_cast %241 : vector<1x32x8xf32> to vector<32x8xf32>
    %cst_161 = arith.constant dense<0.000000e+00> : vector<16x8xf32>
    %243 = tpu.matmul %1, %242, %cst_161 {dimension_numbers = #tpu.dot_dimension_numbers<[1], [0], [0], [1], [0, 0, 1, 1], [], []>} : vector<16x32xf32>, vector<32x8xf32>, vector<16x8xf32> -> vector<16x8xf32>
    %c16_162 = arith.constant 16 : index
    %c0_163 = arith.constant 0 : index
    %c0_164 = arith.constant 0 : index
    %244 = vector.load %arg6[%c16_162, %c0_163, %c0_164] : memref<24x1x8xf32, #tpu.memory_space<vmem>>, vector<1x1x8xf32>
    %245 = vector.shape_cast %244 : vector<1x1x8xf32> to vector<1x8xf32>
    %246 = vector.broadcast %245 : vector<1x8xf32> to vector<16x8xf32>
    %247 = arith.addf %243, %246 : vector<16x8xf32>
    %c20 = arith.constant 20 : index
    %c0_165 = arith.constant 0 : index
    %c0_166 = arith.constant 0 : index
    %248 = vector.load %arg5[%c20, %c0_165, %c0_166] : memref<24x32x8xf32, #tpu.memory_space<vmem>>, vector<1x32x8xf32>
    %249 = vector.shape_cast %248 : vector<1x32x8xf32> to vector<32x8xf32>
    %cst_167 = arith.constant dense<0.000000e+00> : vector<16x8xf32>
    %250 = tpu.matmul %1, %249, %cst_167 {dimension_numbers = #tpu.dot_dimension_numbers<[1], [0], [0], [1], [0, 0, 1, 1], [], []>} : vector<16x32xf32>, vector<32x8xf32>, vector<16x8xf32> -> vector<16x8xf32>
    %c20_168 = arith.constant 20 : index
    %c0_169 = arith.constant 0 : index
    %c0_170 = arith.constant 0 : index
    %251 = vector.load %arg6[%c20_168, %c0_169, %c0_170] : memref<24x1x8xf32, #tpu.memory_space<vmem>>, vector<1x1x8xf32>
    %252 = vector.shape_cast %251 : vector<1x1x8xf32> to vector<1x8xf32>
    %253 = vector.broadcast %252 : vector<1x8xf32> to vector<16x8xf32>
    %254 = arith.addf %250, %253 : vector<16x8xf32>
    %cst_171 = arith.constant dense<0.000000e+00> : vector<8x16xf32>
    %255 = tpu.matmul %240, %247, %cst_171 {dimension_numbers = #tpu.dot_dimension_numbers<[1], [1], [0], [0], [0, 0, 1, 0], [], []>} : vector<8x8xf32>, vector<16x8xf32>, vector<8x16xf32> -> vector<8x16xf32>
    %cst_172 = arith.constant 0.353553385 : f32
    %256 = vector.broadcast %cst_172 : f32 to vector<8x16xf32>
    %257 = arith.mulf %255, %256 : vector<8x16xf32>
    %cst_173 = arith.constant 0.000000e+00 : f32
    %258 = vector.broadcast %cst_173 : f32 to vector<8x16xf32>
    %259 = arith.cmpf ogt, %3, %258 : vector<8x16xf32>
    %cst_174 = arith.constant -1.000000e+09 : f32
    %260 = vector.broadcast %cst_174 : f32 to vector<8x16xf32>
    %261 = arith.select %259, %257, %260 : vector<8x16xi1>, vector<8x16xf32>
    %cst_175 = arith.constant dense<0xFF800000> : vector<8xf32>
    %262 = vector.multi_reduction <maximumf>, %261, %cst_175 [1] : vector<8x16xf32> to vector<8xf32>
    %263 = vector.shape_cast %262 : vector<8xf32> to vector<8x1xf32>
    %264 = vector.broadcast %263 : vector<8x1xf32> to vector<8x16xf32>
    %265 = arith.subf %261, %264 : vector<8x16xf32>
    %266 = math.exp %265 : vector<8x16xf32>
    %cst_176 = arith.constant dense<0.000000e+00> : vector<8xf32>
    %267 = vector.multi_reduction <add>, %266, %cst_176 [1] : vector<8x16xf32> to vector<8xf32>
    %268 = vector.shape_cast %267 : vector<8xf32> to vector<8x1xf32>
    %269 = tpu.reciprocal %268 {approx = true} : vector<8x1xf32> -> vector<8x1xf32>
    %270 = vector.broadcast %269 : vector<8x1xf32> to vector<8x16xf32>
    %271 = arith.mulf %266, %270 : vector<8x16xf32>
    %cst_177 = arith.constant dense<0.000000e+00> : vector<8x8xf32>
    %272 = tpu.matmul %271, %254, %cst_177 {dimension_numbers = #tpu.dot_dimension_numbers<[1], [0], [0], [1], [0, 0, 1, 1], [], []>} : vector<8x16xf32>, vector<16x8xf32>, vector<8x8xf32> -> vector<8x8xf32>
    %c4_178 = arith.constant 4 : index
    %c0_179 = arith.constant 0 : index
    %c0_180 = arith.constant 0 : index
    %273 = vector.load %arg7[%c4_178, %c0_179, %c0_180] : memref<8x8x32xf32, #tpu.memory_space<vmem>>, vector<1x8x32xf32>
    %274 = vector.shape_cast %273 : vector<1x8x32xf32> to vector<8x32xf32>
    %cst_181 = arith.constant dense<0.000000e+00> : vector<8x32xf32>
    %275 = tpu.matmul %272, %274, %cst_181 {dimension_numbers = #tpu.dot_dimension_numbers<[1], [0], [0], [1], [0, 0, 1, 1], [], []>} : vector<8x8xf32>, vector<8x32xf32>, vector<8x32xf32> -> vector<8x32xf32>
    %276 = arith.addf %233, %275 : vector<8x32xf32>
    %c13 = arith.constant 13 : index
    %c0_182 = arith.constant 0 : index
    %c0_183 = arith.constant 0 : index
    %277 = vector.load %arg5[%c13, %c0_182, %c0_183] : memref<24x32x8xf32, #tpu.memory_space<vmem>>, vector<1x32x8xf32>
    %278 = vector.shape_cast %277 : vector<1x32x8xf32> to vector<32x8xf32>
    %cst_184 = arith.constant dense<0.000000e+00> : vector<8x8xf32>
    %279 = tpu.matmul %232, %278, %cst_184 {dimension_numbers = #tpu.dot_dimension_numbers<[1], [0], [0], [1], [0, 0, 1, 1], [], []>} : vector<8x32xf32>, vector<32x8xf32>, vector<8x8xf32> -> vector<8x8xf32>
    %c13_185 = arith.constant 13 : index
    %c0_186 = arith.constant 0 : index
    %c0_187 = arith.constant 0 : index
    %280 = vector.load %arg6[%c13_185, %c0_186, %c0_187] : memref<24x1x8xf32, #tpu.memory_space<vmem>>, vector<1x1x8xf32>
    %281 = vector.shape_cast %280 : vector<1x1x8xf32> to vector<1x8xf32>
    %282 = vector.broadcast %281 : vector<1x8xf32> to vector<8x8xf32>
    %283 = arith.addf %279, %282 : vector<8x8xf32>
    %c17 = arith.constant 17 : index
    %c0_188 = arith.constant 0 : index
    %c0_189 = arith.constant 0 : index
    %284 = vector.load %arg5[%c17, %c0_188, %c0_189] : memref<24x32x8xf32, #tpu.memory_space<vmem>>, vector<1x32x8xf32>
    %285 = vector.shape_cast %284 : vector<1x32x8xf32> to vector<32x8xf32>
    %cst_190 = arith.constant dense<0.000000e+00> : vector<16x8xf32>
    %286 = tpu.matmul %1, %285, %cst_190 {dimension_numbers = #tpu.dot_dimension_numbers<[1], [0], [0], [1], [0, 0, 1, 1], [], []>} : vector<16x32xf32>, vector<32x8xf32>, vector<16x8xf32> -> vector<16x8xf32>
    %c17_191 = arith.constant 17 : index
    %c0_192 = arith.constant 0 : index
    %c0_193 = arith.constant 0 : index
    %287 = vector.load %arg6[%c17_191, %c0_192, %c0_193] : memref<24x1x8xf32, #tpu.memory_space<vmem>>, vector<1x1x8xf32>
    %288 = vector.shape_cast %287 : vector<1x1x8xf32> to vector<1x8xf32>
    %289 = vector.broadcast %288 : vector<1x8xf32> to vector<16x8xf32>
    %290 = arith.addf %286, %289 : vector<16x8xf32>
    %c21 = arith.constant 21 : index
    %c0_194 = arith.constant 0 : index
    %c0_195 = arith.constant 0 : index
    %291 = vector.load %arg5[%c21, %c0_194, %c0_195] : memref<24x32x8xf32, #tpu.memory_space<vmem>>, vector<1x32x8xf32>
    %292 = vector.shape_cast %291 : vector<1x32x8xf32> to vector<32x8xf32>
    %cst_196 = arith.constant dense<0.000000e+00> : vector<16x8xf32>
    %293 = tpu.matmul %1, %292, %cst_196 {dimension_numbers = #tpu.dot_dimension_numbers<[1], [0], [0], [1], [0, 0, 1, 1], [], []>} : vector<16x32xf32>, vector<32x8xf32>, vector<16x8xf32> -> vector<16x8xf32>
    %c21_197 = arith.constant 21 : index
    %c0_198 = arith.constant 0 : index
    %c0_199 = arith.constant 0 : index
    %294 = vector.load %arg6[%c21_197, %c0_198, %c0_199] : memref<24x1x8xf32, #tpu.memory_space<vmem>>, vector<1x1x8xf32>
    %295 = vector.shape_cast %294 : vector<1x1x8xf32> to vector<1x8xf32>
    %296 = vector.broadcast %295 : vector<1x8xf32> to vector<16x8xf32>
    %297 = arith.addf %293, %296 : vector<16x8xf32>
    %cst_200 = arith.constant dense<0.000000e+00> : vector<8x16xf32>
    %298 = tpu.matmul %283, %290, %cst_200 {dimension_numbers = #tpu.dot_dimension_numbers<[1], [1], [0], [0], [0, 0, 1, 0], [], []>} : vector<8x8xf32>, vector<16x8xf32>, vector<8x16xf32> -> vector<8x16xf32>
    %cst_201 = arith.constant 0.353553385 : f32
    %299 = vector.broadcast %cst_201 : f32 to vector<8x16xf32>
    %300 = arith.mulf %298, %299 : vector<8x16xf32>
    %cst_202 = arith.constant 0.000000e+00 : f32
    %301 = vector.broadcast %cst_202 : f32 to vector<8x16xf32>
    %302 = arith.cmpf ogt, %3, %301 : vector<8x16xf32>
    %cst_203 = arith.constant -1.000000e+09 : f32
    %303 = vector.broadcast %cst_203 : f32 to vector<8x16xf32>
    %304 = arith.select %302, %300, %303 : vector<8x16xi1>, vector<8x16xf32>
    %cst_204 = arith.constant dense<0xFF800000> : vector<8xf32>
    %305 = vector.multi_reduction <maximumf>, %304, %cst_204 [1] : vector<8x16xf32> to vector<8xf32>
    %306 = vector.shape_cast %305 : vector<8xf32> to vector<8x1xf32>
    %307 = vector.broadcast %306 : vector<8x1xf32> to vector<8x16xf32>
    %308 = arith.subf %304, %307 : vector<8x16xf32>
    %309 = math.exp %308 : vector<8x16xf32>
    %cst_205 = arith.constant dense<0.000000e+00> : vector<8xf32>
    %310 = vector.multi_reduction <add>, %309, %cst_205 [1] : vector<8x16xf32> to vector<8xf32>
    %311 = vector.shape_cast %310 : vector<8xf32> to vector<8x1xf32>
    %312 = tpu.reciprocal %311 {approx = true} : vector<8x1xf32> -> vector<8x1xf32>
    %313 = vector.broadcast %312 : vector<8x1xf32> to vector<8x16xf32>
    %314 = arith.mulf %309, %313 : vector<8x16xf32>
    %cst_206 = arith.constant dense<0.000000e+00> : vector<8x8xf32>
    %315 = tpu.matmul %314, %297, %cst_206 {dimension_numbers = #tpu.dot_dimension_numbers<[1], [0], [0], [1], [0, 0, 1, 1], [], []>} : vector<8x16xf32>, vector<16x8xf32>, vector<8x8xf32> -> vector<8x8xf32>
    %c5_207 = arith.constant 5 : index
    %c0_208 = arith.constant 0 : index
    %c0_209 = arith.constant 0 : index
    %316 = vector.load %arg7[%c5_207, %c0_208, %c0_209] : memref<8x8x32xf32, #tpu.memory_space<vmem>>, vector<1x8x32xf32>
    %317 = vector.shape_cast %316 : vector<1x8x32xf32> to vector<8x32xf32>
    %cst_210 = arith.constant dense<0.000000e+00> : vector<8x32xf32>
    %318 = tpu.matmul %315, %317, %cst_210 {dimension_numbers = #tpu.dot_dimension_numbers<[1], [0], [0], [1], [0, 0, 1, 1], [], []>} : vector<8x8xf32>, vector<8x32xf32>, vector<8x32xf32> -> vector<8x32xf32>
    %319 = arith.addf %276, %318 : vector<8x32xf32>
    %c14 = arith.constant 14 : index
    %c0_211 = arith.constant 0 : index
    %c0_212 = arith.constant 0 : index
    %320 = vector.load %arg5[%c14, %c0_211, %c0_212] : memref<24x32x8xf32, #tpu.memory_space<vmem>>, vector<1x32x8xf32>
    %321 = vector.shape_cast %320 : vector<1x32x8xf32> to vector<32x8xf32>
    %cst_213 = arith.constant dense<0.000000e+00> : vector<8x8xf32>
    %322 = tpu.matmul %232, %321, %cst_213 {dimension_numbers = #tpu.dot_dimension_numbers<[1], [0], [0], [1], [0, 0, 1, 1], [], []>} : vector<8x32xf32>, vector<32x8xf32>, vector<8x8xf32> -> vector<8x8xf32>
    %c14_214 = arith.constant 14 : index
    %c0_215 = arith.constant 0 : index
    %c0_216 = arith.constant 0 : index
    %323 = vector.load %arg6[%c14_214, %c0_215, %c0_216] : memref<24x1x8xf32, #tpu.memory_space<vmem>>, vector<1x1x8xf32>
    %324 = vector.shape_cast %323 : vector<1x1x8xf32> to vector<1x8xf32>
    %325 = vector.broadcast %324 : vector<1x8xf32> to vector<8x8xf32>
    %326 = arith.addf %322, %325 : vector<8x8xf32>
    %c18 = arith.constant 18 : index
    %c0_217 = arith.constant 0 : index
    %c0_218 = arith.constant 0 : index
    %327 = vector.load %arg5[%c18, %c0_217, %c0_218] : memref<24x32x8xf32, #tpu.memory_space<vmem>>, vector<1x32x8xf32>
    %328 = vector.shape_cast %327 : vector<1x32x8xf32> to vector<32x8xf32>
    %cst_219 = arith.constant dense<0.000000e+00> : vector<16x8xf32>
    %329 = tpu.matmul %1, %328, %cst_219 {dimension_numbers = #tpu.dot_dimension_numbers<[1], [0], [0], [1], [0, 0, 1, 1], [], []>} : vector<16x32xf32>, vector<32x8xf32>, vector<16x8xf32> -> vector<16x8xf32>
    %c18_220 = arith.constant 18 : index
    %c0_221 = arith.constant 0 : index
    %c0_222 = arith.constant 0 : index
    %330 = vector.load %arg6[%c18_220, %c0_221, %c0_222] : memref<24x1x8xf32, #tpu.memory_space<vmem>>, vector<1x1x8xf32>
    %331 = vector.shape_cast %330 : vector<1x1x8xf32> to vector<1x8xf32>
    %332 = vector.broadcast %331 : vector<1x8xf32> to vector<16x8xf32>
    %333 = arith.addf %329, %332 : vector<16x8xf32>
    %c22 = arith.constant 22 : index
    %c0_223 = arith.constant 0 : index
    %c0_224 = arith.constant 0 : index
    %334 = vector.load %arg5[%c22, %c0_223, %c0_224] : memref<24x32x8xf32, #tpu.memory_space<vmem>>, vector<1x32x8xf32>
    %335 = vector.shape_cast %334 : vector<1x32x8xf32> to vector<32x8xf32>
    %cst_225 = arith.constant dense<0.000000e+00> : vector<16x8xf32>
    %336 = tpu.matmul %1, %335, %cst_225 {dimension_numbers = #tpu.dot_dimension_numbers<[1], [0], [0], [1], [0, 0, 1, 1], [], []>} : vector<16x32xf32>, vector<32x8xf32>, vector<16x8xf32> -> vector<16x8xf32>
    %c22_226 = arith.constant 22 : index
    %c0_227 = arith.constant 0 : index
    %c0_228 = arith.constant 0 : index
    %337 = vector.load %arg6[%c22_226, %c0_227, %c0_228] : memref<24x1x8xf32, #tpu.memory_space<vmem>>, vector<1x1x8xf32>
    %338 = vector.shape_cast %337 : vector<1x1x8xf32> to vector<1x8xf32>
    %339 = vector.broadcast %338 : vector<1x8xf32> to vector<16x8xf32>
    %340 = arith.addf %336, %339 : vector<16x8xf32>
    %cst_229 = arith.constant dense<0.000000e+00> : vector<8x16xf32>
    %341 = tpu.matmul %326, %333, %cst_229 {dimension_numbers = #tpu.dot_dimension_numbers<[1], [1], [0], [0], [0, 0, 1, 0], [], []>} : vector<8x8xf32>, vector<16x8xf32>, vector<8x16xf32> -> vector<8x16xf32>
    %cst_230 = arith.constant 0.353553385 : f32
    %342 = vector.broadcast %cst_230 : f32 to vector<8x16xf32>
    %343 = arith.mulf %341, %342 : vector<8x16xf32>
    %cst_231 = arith.constant 0.000000e+00 : f32
    %344 = vector.broadcast %cst_231 : f32 to vector<8x16xf32>
    %345 = arith.cmpf ogt, %3, %344 : vector<8x16xf32>
    %cst_232 = arith.constant -1.000000e+09 : f32
    %346 = vector.broadcast %cst_232 : f32 to vector<8x16xf32>
    %347 = arith.select %345, %343, %346 : vector<8x16xi1>, vector<8x16xf32>
    %cst_233 = arith.constant dense<0xFF800000> : vector<8xf32>
    %348 = vector.multi_reduction <maximumf>, %347, %cst_233 [1] : vector<8x16xf32> to vector<8xf32>
    %349 = vector.shape_cast %348 : vector<8xf32> to vector<8x1xf32>
    %350 = vector.broadcast %349 : vector<8x1xf32> to vector<8x16xf32>
    %351 = arith.subf %347, %350 : vector<8x16xf32>
    %352 = math.exp %351 : vector<8x16xf32>
    %cst_234 = arith.constant dense<0.000000e+00> : vector<8xf32>
    %353 = vector.multi_reduction <add>, %352, %cst_234 [1] : vector<8x16xf32> to vector<8xf32>
    %354 = vector.shape_cast %353 : vector<8xf32> to vector<8x1xf32>
    %355 = tpu.reciprocal %354 {approx = true} : vector<8x1xf32> -> vector<8x1xf32>
    %356 = vector.broadcast %355 : vector<8x1xf32> to vector<8x16xf32>
    %357 = arith.mulf %352, %356 : vector<8x16xf32>
    %cst_235 = arith.constant dense<0.000000e+00> : vector<8x8xf32>
    %358 = tpu.matmul %357, %340, %cst_235 {dimension_numbers = #tpu.dot_dimension_numbers<[1], [0], [0], [1], [0, 0, 1, 1], [], []>} : vector<8x16xf32>, vector<16x8xf32>, vector<8x8xf32> -> vector<8x8xf32>
    %c6_236 = arith.constant 6 : index
    %c0_237 = arith.constant 0 : index
    %c0_238 = arith.constant 0 : index
    %359 = vector.load %arg7[%c6_236, %c0_237, %c0_238] : memref<8x8x32xf32, #tpu.memory_space<vmem>>, vector<1x8x32xf32>
    %360 = vector.shape_cast %359 : vector<1x8x32xf32> to vector<8x32xf32>
    %cst_239 = arith.constant dense<0.000000e+00> : vector<8x32xf32>
    %361 = tpu.matmul %358, %360, %cst_239 {dimension_numbers = #tpu.dot_dimension_numbers<[1], [0], [0], [1], [0, 0, 1, 1], [], []>} : vector<8x8xf32>, vector<8x32xf32>, vector<8x32xf32> -> vector<8x32xf32>
    %362 = arith.addf %319, %361 : vector<8x32xf32>
    %c15 = arith.constant 15 : index
    %c0_240 = arith.constant 0 : index
    %c0_241 = arith.constant 0 : index
    %363 = vector.load %arg5[%c15, %c0_240, %c0_241] : memref<24x32x8xf32, #tpu.memory_space<vmem>>, vector<1x32x8xf32>
    %364 = vector.shape_cast %363 : vector<1x32x8xf32> to vector<32x8xf32>
    %cst_242 = arith.constant dense<0.000000e+00> : vector<8x8xf32>
    %365 = tpu.matmul %232, %364, %cst_242 {dimension_numbers = #tpu.dot_dimension_numbers<[1], [0], [0], [1], [0, 0, 1, 1], [], []>} : vector<8x32xf32>, vector<32x8xf32>, vector<8x8xf32> -> vector<8x8xf32>
    %c15_243 = arith.constant 15 : index
    %c0_244 = arith.constant 0 : index
    %c0_245 = arith.constant 0 : index
    %366 = vector.load %arg6[%c15_243, %c0_244, %c0_245] : memref<24x1x8xf32, #tpu.memory_space<vmem>>, vector<1x1x8xf32>
    %367 = vector.shape_cast %366 : vector<1x1x8xf32> to vector<1x8xf32>
    %368 = vector.broadcast %367 : vector<1x8xf32> to vector<8x8xf32>
    %369 = arith.addf %365, %368 : vector<8x8xf32>
    %c19 = arith.constant 19 : index
    %c0_246 = arith.constant 0 : index
    %c0_247 = arith.constant 0 : index
    %370 = vector.load %arg5[%c19, %c0_246, %c0_247] : memref<24x32x8xf32, #tpu.memory_space<vmem>>, vector<1x32x8xf32>
    %371 = vector.shape_cast %370 : vector<1x32x8xf32> to vector<32x8xf32>
    %cst_248 = arith.constant dense<0.000000e+00> : vector<16x8xf32>
    %372 = tpu.matmul %1, %371, %cst_248 {dimension_numbers = #tpu.dot_dimension_numbers<[1], [0], [0], [1], [0, 0, 1, 1], [], []>} : vector<16x32xf32>, vector<32x8xf32>, vector<16x8xf32> -> vector<16x8xf32>
    %c19_249 = arith.constant 19 : index
    %c0_250 = arith.constant 0 : index
    %c0_251 = arith.constant 0 : index
    %373 = vector.load %arg6[%c19_249, %c0_250, %c0_251] : memref<24x1x8xf32, #tpu.memory_space<vmem>>, vector<1x1x8xf32>
    %374 = vector.shape_cast %373 : vector<1x1x8xf32> to vector<1x8xf32>
    %375 = vector.broadcast %374 : vector<1x8xf32> to vector<16x8xf32>
    %376 = arith.addf %372, %375 : vector<16x8xf32>
    %c23 = arith.constant 23 : index
    %c0_252 = arith.constant 0 : index
    %c0_253 = arith.constant 0 : index
    %377 = vector.load %arg5[%c23, %c0_252, %c0_253] : memref<24x32x8xf32, #tpu.memory_space<vmem>>, vector<1x32x8xf32>
    %378 = vector.shape_cast %377 : vector<1x32x8xf32> to vector<32x8xf32>
    %cst_254 = arith.constant dense<0.000000e+00> : vector<16x8xf32>
    %379 = tpu.matmul %1, %378, %cst_254 {dimension_numbers = #tpu.dot_dimension_numbers<[1], [0], [0], [1], [0, 0, 1, 1], [], []>} : vector<16x32xf32>, vector<32x8xf32>, vector<16x8xf32> -> vector<16x8xf32>
    %c23_255 = arith.constant 23 : index
    %c0_256 = arith.constant 0 : index
    %c0_257 = arith.constant 0 : index
    %380 = vector.load %arg6[%c23_255, %c0_256, %c0_257] : memref<24x1x8xf32, #tpu.memory_space<vmem>>, vector<1x1x8xf32>
    %381 = vector.shape_cast %380 : vector<1x1x8xf32> to vector<1x8xf32>
    %382 = vector.broadcast %381 : vector<1x8xf32> to vector<16x8xf32>
    %383 = arith.addf %379, %382 : vector<16x8xf32>
    %cst_258 = arith.constant dense<0.000000e+00> : vector<8x16xf32>
    %384 = tpu.matmul %369, %376, %cst_258 {dimension_numbers = #tpu.dot_dimension_numbers<[1], [1], [0], [0], [0, 0, 1, 0], [], []>} : vector<8x8xf32>, vector<16x8xf32>, vector<8x16xf32> -> vector<8x16xf32>
    %cst_259 = arith.constant 0.353553385 : f32
    %385 = vector.broadcast %cst_259 : f32 to vector<8x16xf32>
    %386 = arith.mulf %384, %385 : vector<8x16xf32>
    %cst_260 = arith.constant 0.000000e+00 : f32
    %387 = vector.broadcast %cst_260 : f32 to vector<8x16xf32>
    %388 = arith.cmpf ogt, %3, %387 : vector<8x16xf32>
    %cst_261 = arith.constant -1.000000e+09 : f32
    %389 = vector.broadcast %cst_261 : f32 to vector<8x16xf32>
    %390 = arith.select %388, %386, %389 : vector<8x16xi1>, vector<8x16xf32>
    %cst_262 = arith.constant dense<0xFF800000> : vector<8xf32>
    %391 = vector.multi_reduction <maximumf>, %390, %cst_262 [1] : vector<8x16xf32> to vector<8xf32>
    %392 = vector.shape_cast %391 : vector<8xf32> to vector<8x1xf32>
    %393 = vector.broadcast %392 : vector<8x1xf32> to vector<8x16xf32>
    %394 = arith.subf %390, %393 : vector<8x16xf32>
    %395 = math.exp %394 : vector<8x16xf32>
    %cst_263 = arith.constant dense<0.000000e+00> : vector<8xf32>
    %396 = vector.multi_reduction <add>, %395, %cst_263 [1] : vector<8x16xf32> to vector<8xf32>
    %397 = vector.shape_cast %396 : vector<8xf32> to vector<8x1xf32>
    %398 = tpu.reciprocal %397 {approx = true} : vector<8x1xf32> -> vector<8x1xf32>
    %399 = vector.broadcast %398 : vector<8x1xf32> to vector<8x16xf32>
    %400 = arith.mulf %395, %399 : vector<8x16xf32>
    %cst_264 = arith.constant dense<0.000000e+00> : vector<8x8xf32>
    %401 = tpu.matmul %400, %383, %cst_264 {dimension_numbers = #tpu.dot_dimension_numbers<[1], [0], [0], [1], [0, 0, 1, 1], [], []>} : vector<8x16xf32>, vector<16x8xf32>, vector<8x8xf32> -> vector<8x8xf32>
    %c7_265 = arith.constant 7 : index
    %c0_266 = arith.constant 0 : index
    %c0_267 = arith.constant 0 : index
    %402 = vector.load %arg7[%c7_265, %c0_266, %c0_267] : memref<8x8x32xf32, #tpu.memory_space<vmem>>, vector<1x8x32xf32>
    %403 = vector.shape_cast %402 : vector<1x8x32xf32> to vector<8x32xf32>
    %cst_268 = arith.constant dense<0.000000e+00> : vector<8x32xf32>
    %404 = tpu.matmul %401, %403, %cst_268 {dimension_numbers = #tpu.dot_dimension_numbers<[1], [0], [0], [1], [0, 0, 1, 1], [], []>} : vector<8x8xf32>, vector<8x32xf32>, vector<8x32xf32> -> vector<8x32xf32>
    %405 = arith.addf %362, %404 : vector<8x32xf32>
    %406 = vector.broadcast %11 : vector<1x32xf32> to vector<8x32xf32>
    %407 = arith.addf %405, %406 : vector<8x32xf32>
    %408 = arith.addf %210, %407 : vector<8x32xf32>
    %cst_269 = arith.constant dense<0.000000e+00> : vector<8xf32>
    %409 = vector.multi_reduction <add>, %408, %cst_269 [1] : vector<8x32xf32> to vector<8xf32>
    %410 = vector.shape_cast %409 : vector<8xf32> to vector<8x1xf32>
    %cst_270 = arith.constant 3.200000e+01 : f32
    %411 = vector.broadcast %cst_270 : f32 to vector<8x1xf32>
    %412 = arith.divf %410, %411 : vector<8x1xf32>
    %413 = vector.broadcast %412 : vector<8x1xf32> to vector<8x32xf32>
    %414 = arith.subf %408, %413 : vector<8x32xf32>
    %415 = arith.mulf %414, %414 : vector<8x32xf32>
    %cst_271 = arith.constant dense<0.000000e+00> : vector<8xf32>
    %416 = vector.multi_reduction <add>, %415, %cst_271 [1] : vector<8x32xf32> to vector<8xf32>
    %417 = vector.shape_cast %416 : vector<8xf32> to vector<8x1xf32>
    %cst_272 = arith.constant 3.200000e+01 : f32
    %418 = vector.broadcast %cst_272 : f32 to vector<8x1xf32>
    %419 = arith.divf %417, %418 : vector<8x1xf32>
    %420 = vector.broadcast %412 : vector<8x1xf32> to vector<8x32xf32>
    %421 = arith.subf %408, %420 : vector<8x32xf32>
    %cst_273 = arith.constant 9.99999974E-6 : f32
    %422 = vector.broadcast %cst_273 : f32 to vector<8x1xf32>
    %423 = arith.addf %419, %422 : vector<8x1xf32>
    %424 = math.rsqrt %423 : vector<8x1xf32>
    %425 = vector.broadcast %424 : vector<8x1xf32> to vector<8x32xf32>
    %426 = arith.mulf %421, %425 : vector<8x32xf32>
    %427 = vector.broadcast %8 : vector<1x32xf32> to vector<8x32xf32>
    %428 = arith.mulf %426, %427 : vector<8x32xf32>
    %429 = vector.broadcast %9 : vector<1x32xf32> to vector<8x32xf32>
    %430 = arith.addf %428, %429 : vector<8x32xf32>
    %c0_274 = arith.constant 0 : index
    %c0_275 = arith.constant 0 : index
    %431 = vector.load %arg8[%c0_274, %c0_275] : memref<32x64xf32, #tpu.memory_space<vmem>>, vector<32x64xf32>
    %cst_276 = arith.constant dense<0.000000e+00> : vector<8x64xf32>
    %432 = tpu.matmul %430, %431, %cst_276 {dimension_numbers = #tpu.dot_dimension_numbers<[1], [0], [0], [1], [0, 0, 1, 1], [], []>} : vector<8x32xf32>, vector<32x64xf32>, vector<8x64xf32> -> vector<8x64xf32>
    %c0_277 = arith.constant 0 : index
    %c0_278 = arith.constant 0 : index
    %433 = vector.load %arg9[%c0_277, %c0_278] : memref<1x64xf32, #tpu.memory_space<vmem>>, vector<1x64xf32>
    %434 = vector.broadcast %433 : vector<1x64xf32> to vector<8x64xf32>
    %435 = arith.addf %432, %434 : vector<8x64xf32>
    %cst_279 = arith.constant 0.000000e+00 : f32
    %436 = vector.broadcast %cst_279 : f32 to vector<8x64xf32>
    %437 = arith.maximumf %435, %436 : vector<8x64xf32>
    %c0_280 = arith.constant 0 : index
    %c0_281 = arith.constant 0 : index
    %438 = vector.load %arg10[%c0_280, %c0_281] : memref<64x32xf32, #tpu.memory_space<vmem>>, vector<64x32xf32>
    %cst_282 = arith.constant dense<0.000000e+00> : vector<8x32xf32>
    %439 = tpu.matmul %437, %438, %cst_282 {dimension_numbers = #tpu.dot_dimension_numbers<[1], [0], [0], [1], [0, 0, 1, 1], [], []>} : vector<8x64xf32>, vector<64x32xf32>, vector<8x32xf32> -> vector<8x32xf32>
    %440 = vector.broadcast %12 : vector<1x32xf32> to vector<8x32xf32>
    %441 = arith.addf %439, %440 : vector<8x32xf32>
    %442 = arith.addf %408, %441 : vector<8x32xf32>
    %c0_283 = arith.constant 0 : index
    %c0_284 = arith.constant 0 : index
    %443 = vector.load %arg12[%c0_283, %c0_284] : memref<8x32xf32, #tpu.memory_space<vmem>>, vector<8x32xf32>
    tpu.vector_store %arg12[%c0_283, %c0_284], %442 {strides = array<i32>} : memref<8x32xf32, #tpu.memory_space<vmem>>, vector<8x32xf32>,
    return
  }
  func.func @transform_0(%arg0: i32) -> (i32, i32) {
    %c0_i32 = arith.constant 0 : i32
    %c0_i32_0 = arith.constant 0 : i32
    return %arg0, %c0_i32 : i32, i32
  }
  func.func @transform_1(%arg0: i32) -> (i32, i32) {
    %c0_i32 = arith.constant 0 : i32
    %c0_i32_0 = arith.constant 0 : i32
    return %arg0, %c0_i32 : i32, i32
  }
  func.func @transform_2(%arg0: i32) -> (i32, i32) {
    %c0_i32 = arith.constant 0 : i32
    %c0_i32_0 = arith.constant 0 : i32
    %c0_i32_1 = arith.constant 0 : i32
    return %c0_i32, %c0_i32_0 : i32, i32
  }
  func.func @transform_3(%arg0: i32) -> (i32, i32) {
    %c0_i32 = arith.constant 0 : i32
    %c0_i32_0 = arith.constant 0 : i32
    %c0_i32_1 = arith.constant 0 : i32
    return %c0_i32, %c0_i32_0 : i32, i32
  }
  func.func @transform_4(%arg0: i32) -> (i32, i32, i32) {
    %c0_i32 = arith.constant 0 : i32
    %c0_i32_0 = arith.constant 0 : i32
    %c0_i32_1 = arith.constant 0 : i32
    %c0_i32_2 = arith.constant 0 : i32
    return %c0_i32, %c0_i32_0, %c0_i32_1 : i32, i32, i32
  }
  func.func @transform_5(%arg0: i32) -> (i32, i32, i32) {
    %c0_i32 = arith.constant 0 : i32
    %c0_i32_0 = arith.constant 0 : i32
    %c0_i32_1 = arith.constant 0 : i32
    %c0_i32_2 = arith.constant 0 : i32
    return %c0_i32, %c0_i32_0, %c0_i32_1 : i32, i32, i32
  }
  func.func @transform_6(%arg0: i32) -> (i32, i32, i32) {
    %c0_i32 = arith.constant 0 : i32
    %c0_i32_0 = arith.constant 0 : i32
    %c0_i32_1 = arith.constant 0 : i32
    %c0_i32_2 = arith.constant 0 : i32
    return %c0_i32, %c0_i32_0, %c0_i32_1 : i32, i32, i32
  }
  func.func @transform_7(%arg0: i32) -> (i32, i32) {
    %c0_i32 = arith.constant 0 : i32
    %c0_i32_0 = arith.constant 0 : i32
    %c0_i32_1 = arith.constant 0 : i32
    return %c0_i32, %c0_i32_0 : i32, i32
  }
  func.func @transform_8(%arg0: i32) -> (i32, i32) {
    %c0_i32 = arith.constant 0 : i32
    %c0_i32_0 = arith.constant 0 : i32
    %c0_i32_1 = arith.constant 0 : i32
    return %c0_i32, %c0_i32_0 : i32, i32
  }
  func.func @transform_9(%arg0: i32) -> (i32, i32) {
    %c0_i32 = arith.constant 0 : i32
    %c0_i32_0 = arith.constant 0 : i32
    %c0_i32_1 = arith.constant 0 : i32
    return %c0_i32, %c0_i32_0 : i32, i32
  }
  func.func @transform_10(%arg0: i32) -> (i32, i32) {
    %c0_i32 = arith.constant 0 : i32
    %c0_i32_0 = arith.constant 0 : i32
    %c0_i32_1 = arith.constant 0 : i32
    return %c0_i32, %c0_i32_0 : i32, i32
  }
  func.func @transform_11(%arg0: i32) -> (i32, i32) {
    %c0_i32 = arith.constant 0 : i32
    %c0_i32_0 = arith.constant 0 : i32
    return %arg0, %c0_i32 : i32, i32
  }
}

</mosaic_0001>

<bundles_post_ra>
// kernel: decoder_layer.1
= control target key start
LH: loop header
LB: loop body
LE: loop exit
PB: predicated region body
PF: predicated region fallthrough
CT: control target
= control target key end

     0   :  { %s3312_s0 = inlined_call_operand.vmem [shape: f32[16,32], index: 0, kind: input, shape index: {}]   ;;  %s3313_s1 = inlined_call_operand.vmem [shape: f32[32,32], index: 1, kind: input, shape index: {}]   ;;  %s3314_s2 = inlined_call_operand.vmem [shape: f32[8,8], index: 2, kind: input, shape index: {}]   ;;  %s3315_s3 = inlined_call_operand.vmem [shape: f32[8,16], index: 3, kind: input, shape index: {}]   ;;  %s3316_s4 = inlined_call_operand.vmem [shape: f32[24,32,8], index: 4, kind: input, shape index: {}]   ;;  %s3317_s5 = inlined_call_operand.vmem [shape: f32[24,1,8], index: 5, kind: input, shape index: {}]   ;;  %s3318_s6 = inlined_call_operand.vmem [shape: f32[8,8,32], index: 6, kind: input, shape index: {}]   ;;  %s3319_s7 = inlined_call_operand.vmem [shape: f32[32,64], index: 7, kind: input, shape index: {}]   ;;  %s3320_s8 = inlined_call_operand.vmem [shape: f32[1,64], index: 8, kind: input, shape index: {}]   ;;  %s3321_s9 = inlined_call_operand.vmem [shape: f32[64,32], index: 9, kind: input, shape index: {}]   ;;  %s3322_s10 = inlined_call_operand.vmem [shape: f32[9,32], index: 10, kind: input, shape index: {}]   ;;  %s3323_s11 = inlined_call_operand.hbm [shape: f32[16,32], index: 11, kind: output, shape index: {}]  }
   0x1   :  { %3324 = sst [smem:[#allocation6_spill]] %s3312_s0 }
   0x2   :  { %3325 = sst [smem:[#allocation7_spill]] %s3314_s2 }
   0x3   :  { %16 = vsyncpa [#allocation3], 0 }
   0x4   :  { %18 = vsyncpa [#allocation3 + $0x1], 0  ;;  %s2576_s17 = smov 0   ;;  %s2578_s18 = smov 0  }
   0x5   :  { %s2580_s19 = smov 0   ;;  %s2582_s20 = smov 0  }
   0x6 LB: > { %s2597_s21 = sadd.s32 4294967295, %s2513_s20   ;;  %s2133_s22 = sadd.s32 4294967294, %s2513_s20   ;;  %s2513_s20 = sphi %s2582_s20, %s3335_s20   ;;  %s2509_s19 = sphi %s2580_s19, %s3334_s19   ;;  %s2505_s18 = sphi %s2578_s18, %s3333_s18   ;;  %s2501_s17 = sphi %s2576_s17, %s3332_s17  }
   0x7   : > { %s2601_s23 = sadd.s32 1, %s2513_s20   ;;  %s272_s24 = sadd.s32 1, %s2509_s19 }
   0x8   : > { %s269_s25 = ssub.s32 %s2513_s20, %s2601_s23  ;;  %p282_p0 = scmp.ne.s32.totalorder %s2509_s19, %s2505_s18 }
   0x9   : > { %p270_p1 = scmp.eq.s32.totalorder %s269_s25, 0  ;;  %p283_p2 = scmp.eq.s32.totalorder %s2597_s21, 1 }
   0xa   : > { %p288_p3 = scmp.ne.s32.totalorder %s2505_s18, %s2501_s17  ;;  %p289_p4 = scmp.eq.s32.totalorder %s2133_s22, 1 }
   0xb   : > { %s2612_s26 = scalar_select %p270_p1, %s2509_s19, %s272_s24  }
   0xc   : > { %p2614_p5 = por %p283_p2, %p282_p0  ;;  %p2618_p6 = por %p289_p4, %p288_p3 }
   0xd   : > { %3326 = sst [smem:[#allocation5_spill]] %s2612_s26  ;;  %p2136_p7 = scmp.ge.s32.totalorder %s2513_s20, 1 }
   0xe   : > { %p350_p8 = scmp.lt.s32.totalorder %s2513_s20, 3 }
  0x10   : > { %p351_p9 = pnand %p2136_p7, %p350_p8 }
  0x11   : > { %p394_p10 = scmp.lt.s32.totalorder (!%p351_p9), %s2597_s21, 1  ;;  %s3329_s0 = sld [smem:[#allocation6_spill]] (!%p351_p9) }
  0x12   : > { %354 = sbr.rel (%p351_p9) target bundleno = 5602 (0x15e2), region = 64  ;;  %s3330_s2 = sld [smem:[#allocation7_spill]] (!%p351_p9) }
  0x13   : > { %s391_s13 = sand.u32 (!%p351_p9), 1, %s2505_s18  }
  0x17   : > { %s395_s29 = scalar_select %p394_p10, %s2597_s21, 1  ;;  %vm418_vm0 = vcmask 261120   ;;  %v2515_v2 = vmov 32.0   ;;  %v455_v14 = vld [vmem:[%s3316_s4 + $0x18] sm:$0xff]  ;;  %v454_v17 = vld [vmem:[%s3316_s4 + $0x10] sm:$0xff]  ;;  %v453_v20 = vld [vmem:[%s3316_s4 + $0x8] sm:$0xff] }
  0x18   : > { %2411 = vrcp.f32 %v2515_v2  ;;  %v2145_v15 = vld [vmem:[%s3316_s4 + $0x98] sm:$0xff]  ;;  %475 = vmatpush.msra.mxu0 %v455_v14  ;;  %v2144_v18 = vld [vmem:[%s3316_s4 + $0x90] sm:$0xff]  ;;  %v2143_v21 = vld [vmem:[%s3316_s4 + $0x88] sm:$0xff]  ;;  %vm543_vm5 = vcmask 64512   ;;  %vm1330_vm11 = vcmask 130048   ;;  %vm2020_vm15 = vcmask 523264  }
  0x19   : > { %s2138_s30 = sshll.u32 %s395_s29, 3  ;;  %v2151_v16 = vld [vmem:[%s3316_s4 + $0x118] sm:$0xff]  ;;  %505 = vmatpush.msra.mxu1 %v2145_v15  ;;  %v2150_v19 = vld [vmem:[%s3316_s4 + $0x110] sm:$0xff]  ;;  %v2149_v22 = vld [vmem:[%s3316_s4 + $0x108] sm:$0xff] }
  0x1a   : > { %s397_s14 = scalar_lea.vmem %s3329_s0, %s2138_s30  ;;  %535 = vmatpush.msra.mxu2 %v2151_v16  ;;  %476 = vmatpush.msra.mxu0 %v454_v17  ;;  %v452_v23 = vld [vmem:[%s3316_s4] sm:$0xff]  ;;  %v2160_v26 = vld [vmem:[%s3316_s4 + $0x38] sm:$0xff]  ;;  %v2159_v29 = vld [vmem:[%s3316_s4 + $0x30] sm:$0xff]  ;;  %s2139_s30 = sshll.u32 %s2597_s21, 1 }
  0x1b   : > { %v2629_v0 = vld [vmem:[%s397_s14] sm:$0xff]  ;;  %506 = vmatpush.msra.mxu1 %v2144_v18  ;;  %v2166_v27 = vld [vmem:[%s3316_s4 + $0xb8] sm:$0xff]  ;;  %v2165_v30 = vld [vmem:[%s3316_s4 + $0xb0] sm:$0xff]  ;;  %p399_p11 = scmp.lt.s32.totalorder %s2139_s30, 3 }
  0x1c   : > { %v419_v1 = vsel %vm418_vm0, %v2629_v0, 0.0  ;;  %536 = vmatpush.msra.mxu2 %v2150_v19  ;;  %477 = vmatpush.msra.mxu0 %v453_v20  ;;  %v2142_v24 = vld [vmem:[%s3316_s4 + $0x80] sm:$0xff]  ;;  %v2172_v28 = vld [vmem:[%s3316_s4 + $0x138] sm:$0xff]  ;;  %v2171_v31 = vld [vmem:[%s3316_s4 + $0x130] sm:$0xff] }
  0x1d   : > { %420 = vadd.xlane.f32.xlu0 %v419_v1  ;;  %507 = vmatpush.msra.mxu1 %v2143_v21  ;;  %v2148_v25 = vld [vmem:[%s3316_s4 + $0x100] sm:$0xff]  ;;  %v2158_v33 = vld [vmem:[%s3316_s4 + $0x28] sm:$0xff]  ;;  %v2184_v19 = vld [vmem:[%s3316_s4 + $0x58] sm:$0xff]  ;;  %s3337_s30 = smov (!%p399_p11, %s2139_s30), 3 }
  0x1e   : > { %v2412_v3 = vpop.eup %2411  ;;  %537 = vmatpush.msra.mxu2 %v2149_v22  ;;  %478 = vmatpush.msra.mxu0 %v452_v23  ;;  %v2164_v34 = vld [vmem:[%s3316_s4 + $0xa8] sm:$0xff]  ;;  %v2157_v37 = vld [vmem:[%s3316_s4 + $0x20] sm:$0xff]  ;;  %v2183_v20 = vld [vmem:[%s3316_s4 + $0x50] sm:$0xff]  ;;  %s2140_s14 = sshll.u32 %s3337_s30, 3 }
  0x1f   : > { %v423_v4 = vmul.f32 32.0, %v2412_v3  ;;  %vm427_vm1 = vweird.f32 %v2412_v3  ;;  %508 = vmatpush.msra.mxu1 %v2142_v24  ;;  %v2170_v36 = vld [vmem:[%s3316_s4 + $0x128] sm:$0xff]  ;;  %v2163_v38 = vld [vmem:[%s3316_s4 + $0xa0] sm:$0xff]  ;;  %s402_s0 = scalar_lea.vmem %s3313_s1, %s2140_s14  ;;  %s2137_s14 = sshll.u32 %s391_s13, 3 }
  0x20   : > { %538 = vmatpush.msra.mxu2 %v2148_v25  ;;  %630 = vmatpush.msrb.mxu0 %v2160_v26  ;;  %v2169_v40 = vld [vmem:[%s3316_s4 + $0x120] sm:$0xff]  ;;  %v2381_v59 = vld [vmem:[%s3317_s5 + $0x8] ss:$0 sm:$0xff]  ;;  %v2384_v2 = vld [vmem:[%s3317_s5 + $0x9] ss:$0 sm:$0xff]  ;;  %s393_s24 = scalar_lea.vmem [#allocation2], %s2137_s14 }
  0x21   : > { %v424_v5 = vsub.f32 1.0, %v423_v4  ;;  %660 = vmatpush.msrb.mxu1 %v2166_v27  ;;  %v2377_v47 = vld [vmem:[%s3322_s10] ss:$0 sm:$0xff]  ;;  %v2378_v49 = vld [vmem:[%s3322_s10 + $0x1] ss:$0 sm:$0xff]  ;;  %v2182_v22 = vld [vmem:[%s3316_s4 + $0x48] sm:$0xff] }
  0x22   : > { %690 = vmatpush.msrb.mxu2 %v2172_v28  ;;  %631 = vmatpush.msrb.mxu0 %v2159_v29  ;;  %v2380_v53 = vld [vmem:[%s3317_s5 + $0x4] ss:$0 sm:$0xff]  ;;  %v2379_v54 = vld [vmem:[%s3317_s5] ss:$0 sm:$0xff]  ;;  %v2383_v60 = vld [vmem:[%s3317_s5 + $0x5] ss:$0 sm:$0xff] }
  0x23   : > { %v425_v6 = vmul.f32 %v2412_v3, %v424_v5  ;;  %661 = vmatpush.msrb.mxu1 %v2165_v30  ;;  %v2757_v5 = vld [vmem:[%s3330_s2] sm:$0xff]  ;;  %s2334_s2 = sshll.u32 %s2597_s21, 3  ;;  %s2059_s25 = sshll.u32 %s393_s24, 4  ;;  %s2060_s25 = int_to_ptr.vmem [resolvable:$true] %s2059_s25 }
  0x24   : > { %691 = vmatpush.msrb.mxu2 %v2171_v31  ;;  %632 = vmatpush.msrb.mxu0 %v2158_v33  ;;  %vm571_vm6 = vcmp.gt.f32.partialorder %v2757_v5, 0.0  ;;  %v2382_v21 = vld [vmem:[%s3317_s5 + $0x1] ss:$0 sm:$0xff]  ;;  %v2225_v5 = vld [vmem:[%s3318_s6 + $0x18] sm:$0xff]  ;;  %s2057_s22 = scalar_lea.hbm %s3323_s11, %s2334_s2  ;;  %s2047_s21 = scalar_lea.sflag [#allocation3], %s391_s13 }
  0x25   : > { %v426_v7 = vadd.f32 %v2412_v3, %v425_v6  ;;  %662 = vmatpush.msrb.mxu1 %v2164_v34  ;;  %v2181_v24 = vld [vmem:[%s3316_s4 + $0x40] sm:$0xff]  ;;  %s2061_s29 = sshll.u32 %s2057_s22, 4  ;;  %s2471_s14 = scalar_lea.hbm %s3323_s11, 16  ;;  %s2062_s29 = int_to_ptr.hbm [resolvable:$true] %s2061_s29 }
  0x26   : > { %692 = vmatpush.msrb.mxu2 %v2170_v36  ;;  %633 = vmatpush.msrb.mxu0 %v2157_v37  ;;  %v607_v26 = vld [vmem:[%s3318_s6] sm:$0xff]  ;;  %v2190_v37 = vld [vmem:[%s3316_s4 + $0xd8] sm:$0xff]  ;;  %s2465_s30 = sshra.s32 %s2062_s29, 4  ;;  %s2466_s30 = int_to_ptr.hbm [resolvable:$true] %s2465_s30 }
  0x27   : > { %v2633_v8 = vsel %vm427_vm1, %v2412_v3, %v426_v7  ;;  %663 = vmatpush.msrb.mxu1 %v2163_v38  ;;  %v2189_v38 = vld [vmem:[%s3316_s4 + $0xd0] sm:$0xff]  ;;  %s2467_s12 = scalar_lea.hbm %s2466_s30, 8  ;;  %p2472_p1 = scmp.lt.s32.totalorder %s2466_s30, %s3323_s11 }
  0x28   : > { %693 = vmatpush.msrb.mxu2 %v2169_v40  ;;  %v2187_v40 = vld [vmem:[%s3316_s4 + $0xc0] sm:$0xff]  ;;  %p2468_p12 = scmp.ne.s32.totalorder %s2466_s30, %s2467_s12  ;;  %p2473_p2 = scmp.lt.s32.totalorder %s2471_s14, %s2467_s12 }
  0x2a   : > { %p2469_p13 = pnand %p2468_p12, %p2614_p5  ;;  %p2474_p3 = por %p2473_p2, %p2472_p1 }
  0x2c   : > { %p2470_p0 = pneg %p2469_p13 }
  0x2e   : > { %p2475_p4 = pnand %p2474_p3, %p2470_p0 }
  0x90   : > { %v421_v9 = vpop.xlane.xlu0 %420 }
  0x91   : > { %v429_v10 = vmul.f32 %v2633_v8, %v421_v9 }
  0x93   : > { %v2637_v11 = vsub.f32 %v2629_v0, %v429_v10 }
  0x95   : > { %v431_v12 = vmul.f32 %v2637_v11, %v2637_v11 }
  0x97   : > { %v432_v13 = vsel %vm418_vm0, %v431_v12, 0.0 }
  0x98   : > { %433 = vadd.xlane.f32.xlu0 %v432_v13 }
 0x10b   : > { %v434_v32 = vpop.xlane.xlu0 %433 }
 0x10c   : > { %v435_v35 = vmul.f32 %v434_v32, %v2633_v8 }
 0x10e   : > { %v436_v39 = vadd.f32 1e-05, %v435_v35 }
 0x110   : > { %2413 = vrsqrt.f32 %v436_v39  ;;  %vm443_vm3 = vweird.f32 %v436_v39 }
 0x116   : > { %v2414_v41 = vpop.eup %2413 }
 0x117   : > { %v438_v42 = vmul.f32 %v2414_v41, %v436_v39  ;;  %vm444_vm2 = vweird.f32 %v2414_v41  ;;  %v2188_v39 = vld [vmem:[%s3316_s4 + $0xc8] sm:$0xff] }
 0x118   : > { %vm445_vm4 = vmor %vm443_vm3, %vm444_vm2 }
 0x119   : > { %v439_v43 = vmul.f32 %v2414_v41, %v438_v42 }
 0x11b   : > { %v440_v44 = vmul.f32 0.5, %v439_v43 }
 0x11d   : > { %v441_v45 = vsub.f32 1.5, %v440_v44  ;;  %v2178_v44 = vld [vmem:[%s3318_s6 + $0x8] sm:$0xff] }
 0x11f   : > { %v442_v46 = vmul.f32 %v2414_v41, %v441_v45  ;;  %v2196_v45 = vld [vmem:[%s3316_s4 + $0x158] sm:$0xff] }
 0x121   : > { %v446_v48 = vsel %vm445_vm4, %v2414_v41, %v442_v46  ;;  %v2195_v46 = vld [vmem:[%s3316_s4 + $0x150] sm:$0xff] }
 0x122   : > { %v447_v50 = vmul.f32 %v446_v48, %v2637_v11  ;;  %v2193_v48 = vld [vmem:[%s3316_s4 + $0x140] sm:$0xff] }
 0x124   : > { %v449_v51 = vmul.f32 %v2377_v47, %v447_v50  ;;  %v2194_v47 = vld [vmem:[%s3316_s4 + $0x148] sm:$0xff] }
 0x126   : > { %v2722_v52 = vadd.f32 %v2378_v49, %v449_v51  ;;  %v2207_v49 = vld [vmem:[%s3316_s4 + $0x78] sm:$0xff]  ;;  %v2206_v51 = vld [vmem:[%s3316_s4 + $0x70] sm:$0xff] }
 0x128   : > { %2141 = vmatmul.msk.f32.vlgmr.msra.gmra.mxu0 %vm418_vm0, %v2722_v52  ;;  %2147 = vmatmul.msk.f32.vlgmr.msra.gmra.mxu1 %vm418_vm0, %v2722_v52 }
 0x129   : > { %2153 = vmatmul.msk.f32.vlgmr.msra.gmra.mxu2 %vm418_vm0, %v2722_v52  ;;  %780 = vmatpush.msra.mxu1 %v2178_v44 }
 0x12a   : > { %803 = vmatpush.msra.mxu2 %v607_v26  ;;  %v2216_v26 = vld [vmem:[%s3316_s4 + $0x160] sm:$0xff] }
 0x130   : > { %2162 = vmatmul.msk.f32.vlgmr.msrb.gmra.mxu0 %vm418_vm0, %v2722_v52  ;;  %2168 = vmatmul.msk.f32.vlgmr.msrb.gmra.mxu1 %vm418_vm0, %v2722_v52 }
 0x131   : > { %2174 = vmatmul.msk.f32.vlgmr.msrb.gmra.mxu2 %vm418_vm0, %v2722_v52  ;;  %890 = vmatpush.msrb.mxu1 %v2196_v45 }
 0x133   : > { %891 = vmatpush.msrb.mxu1 %v2195_v46 }
 0x135   : > { %892 = vmatpush.msrb.mxu1 %v2194_v47 }
 0x137   : > { %893 = vmatpush.msrb.mxu1 %v2193_v48 }
 0x1a5   : > { %v510_v55 = vpop.f32.mrf.mxu1  ;;  %v480_v56 = vpop.f32.mrf.mxu0 }
 0x1a6   : > { %v511_v57 = vadd.f32 %v2380_v53, %v510_v55  ;;  %v481_v58 = vadd.f32 %v2379_v54, %v480_v56  ;;  %v2205_v53 = vld [vmem:[%s3316_s4 + $0x68] sm:$0xff]  ;;  %v2386_v54 = vld [vmem:[%s3317_s5 + $0x6] ss:$0 sm:$0xff]  ;;  %v2385_v56 = vld [vmem:[%s3317_s5 + $0x2] ss:$0 sm:$0xff] }
 0x1a7   : > { %v2204_v55 = vld [vmem:[%s3316_s4 + $0x60] sm:$0xff] }
 0x1a8   : > { %2154 = vmatpush.xpose.msk.msra.mxu3 %vm543_vm5, %v511_v57 }
 0x1ab   : > { %2155 = vmatmul.msk.f32.vlgmr.msra.gmra.mxu3 %vm543_vm5, %v481_v58 }
 0x1ac   : > { %v540_v61 = vpop.f32.mrf.mxu2 }
 0x1ad   : > { %v541_v62 = vadd.f32 %v2381_v59, %v540_v61  ;;  %v665_v63 = vpop.f32.mrf.mxu1  ;;  %v635_v23 = vpop.f32.mrf.mxu0 }
 0x1ae   : > { %v666_v1 = vadd.f32 %v2383_v60, %v665_v63  ;;  %v636_v25 = vadd.f32 %v2382_v21, %v635_v23  ;;  %v2213_v60 = vld [vmem:[%s3316_s4 + $0xf8] sm:$0xff]  ;;  %v2211_v63 = vld [vmem:[%s3316_s4 + $0xe8] sm:$0xff] }
 0x1af   : > { %602 = vmatpush.msrb.mxu3 %v541_v62  ;;  %v2212_v62 = vld [vmem:[%s3316_s4 + $0xf0] sm:$0xff]  ;;  %v2219_v23 = vld [vmem:[%s3316_s4 + $0x178] sm:$0xff] }
 0x1b1   : > { %2175 = vmatpush.xpose.msk.msra.mxu3 %vm543_vm5, %v666_v1  ;;  %v2210_v1 = vld [vmem:[%s3316_s4 + $0xe0] sm:$0xff] }
 0x1b4   : > { %v695_v3 = vpop.f32.mrf.mxu2 }
 0x1b5   : > { %v696_v4 = vadd.f32 %v2384_v2, %v695_v3  ;;  %v2202_v2 = vld [vmem:[%s3318_s6 + $0x10] sm:$0xff] }
 0x1b7   : > { %755 = vmatpush.msra.mxu0 %v696_v4 }
 0x1b9   : > { %860 = vmatpush.msrb.mxu0 %v2190_v37 }
 0x1bb   : > { %861 = vmatpush.msrb.mxu0 %v2189_v38 }
 0x1bd   : > { %862 = vmatpush.msrb.mxu0 %v2188_v39 }
 0x1bf   : > { %863 = vmatpush.msrb.mxu0 %v2187_v40 }
 0x22e   : > { %v567_v6 = vpop.f32.mrf.mxu3 }
 0x22f   : > { %v570_v7 = vmul.f32 0.35355338, %v567_v6 }
 0x231   : > { %v572_v9 = vsel %vm571_vm6, %v570_v7, -1e+09  ;;  %v2387_v7 = vld [vmem:[%s3317_s5 + $0xa] ss:$0 sm:$0xff] }
 0x232   : > { %v573_v10 = vsel %vm543_vm5, %v572_v9, -inf }
 0x233   : > { %574 = vmax.xlane.f32.xlu1 %v573_v10 }
 0x2a6   : > { %v575_v11 = vpop.xlane.xlu1 %574 }
 0x2a7   : > { %v576_v12 = vsub.f32 %v572_v9, %v575_v11 }
 0x2a9   : > { %v577_v13 = vmul.f32 1.442695, %v576_v12 }
 0x2ab   : > { %2415 = vpow2.f32 %v577_v13 }
 0x2b1   : > { %v2416_v14 = vpop.eup %2415 }
 0x2b2   : > { %v579_v15 = vsel %vm543_vm5, %v2416_v14, 0.0 }
 0x2b3   : > { %580 = vadd.xlane.f32.xlu1 %v579_v15  ;;  %v2389_v15 = vld [vmem:[%s3317_s5 + $0x7] ss:$0 sm:$0xff] }
 0x326   : > { %v581_v16 = vpop.xlane.xlu1 %580 }
 0x327   : > { %2417 = vrcp.f32 %v581_v16 }
 0x32d   : > { %v2418_v17 = vpop.eup %2417 }
 0x32e   : > { %v583_v18 = vmul.f32 %v2418_v17, %v2416_v14 }
 0x330   : > { %2156 = vmatmul.msk.f32.vlgmr.msrb.gmra.mxu3 %vm543_vm5, %v583_v18 }
 0x331   : > { %830 = vmatpush.msrb.mxu3 %v2184_v19 }
 0x333   : > { %831 = vmatpush.msrb.mxu3 %v2183_v20 }
 0x335   : > { %832 = vmatpush.msrb.mxu3 %v2182_v22 }
 0x337   : > { %833 = vmatpush.msrb.mxu3 %v2181_v24  ;;  %v2218_v24 = vld [vmem:[%s3316_s4 + $0x170] sm:$0xff] }
 0x338   : > { %2176 = vmatmul.msk.f32.vlgmr.msra.gmra.mxu3 %vm543_vm5, %v636_v25  ;;  %v2217_v25 = vld [vmem:[%s3316_s4 + $0x168] sm:$0xff] }
 0x340   : > { %2186 = vmatmul.msk.f32.vlgmr.msrb.gmra.mxu3 %vm418_vm0, %v2722_v52 }
 0x3b3   : > { %v604_v27 = vpop.f32.mrf.mxu3 }
 0x3b4   : > { %2180 = vmatmul.msk.f32.vlgmr.msra.gmra.mxu2 %vm543_vm5, %v604_v27 }
 0x3bb   : > { %v721_v28 = vpop.f32.mrf.mxu3 }
 0x3bc   : > { %v724_v29 = vmul.f32 0.35355338, %v721_v28 }
 0x3be   : > { %v725_v30 = vsel %vm571_vm6, %v724_v29, -1e+09 }
 0x3bf   : > { %v726_v31 = vsel %vm543_vm5, %v725_v30, -inf }
 0x3c0   : > { %727 = vmax.xlane.f32.xlu2 %v726_v31  ;;  %v2388_v31 = vld [vmem:[%s3317_s5 + $0x3] ss:$0 sm:$0xff] }
 0x3c3   : > { %v835_v58 = vpop.f32.mrf.mxu3 }
 0x3c4   : > { %v836_v61 = vadd.f32 %v2385_v56, %v835_v58 }
 0x433   : > { %v728_v32 = vpop.xlane.xlu2 %727 }
 0x434   : > { %v729_v33 = vsub.f32 %v725_v30, %v728_v32 }
 0x436   : > { %v730_v34 = vmul.f32 1.442695, %v729_v33  ;;  %v2390_v33 = vld [vmem:[%s3317_s5 + $0xb] ss:$0 sm:$0xff] }
 0x437   : > { %v805_v3 = vpop.f32.mrf.mxu2 }
 0x438   : > { %2419 = vpow2.f32 %v730_v34 }
 0x43e   : > { %v2420_v35 = vpop.eup %2419 }
 0x43f   : > { %v732_v36 = vsel %vm543_vm5, %v2420_v35, 0.0 }
 0x440   : > { %733 = vadd.xlane.f32.xlu2 %v732_v36 }
 0x4b3   : > { %v734_v41 = vpop.xlane.xlu2 %733 }
 0x4b4   : > { %2421 = vrcp.f32 %v734_v41 }
 0x4ba   : > { %v2422_v42 = vpop.eup %2421 }
 0x4bb   : > { %v736_v43 = vmul.f32 %v2422_v42, %v2420_v35 }
 0x4bd   : > { %2177 = vmatmul.msk.f32.vlgmr.msra.gmra.mxu0 %vm543_vm5, %v736_v43 }
 0x4be   : > { %980 = vmatpush.msra.mxu0 %v2202_v2  ;;  %v2233_v2 = vld [vmem:[%s3316_s4 + $0x200] sm:$0xff] }
 0x4c5   : > { %2192 = vmatmul.msk.f32.vlgmr.msrb.gmra.mxu0 %vm418_vm0, %v2722_v52 }
 0x53a   : > { %v757_v50 = vpop.f32.mrf.mxu0 }
 0x53b   : > { %2179 = vmatmul.msk.f32.vlgmr.msra.gmra.mxu1 %vm543_vm5, %v757_v50 }
 0x53c   : > { %1008 = vmatpush.msra.mxu1 %v2207_v49 }
 0x53e   : > { %1009 = vmatpush.msra.mxu1 %v2206_v51  ;;  %v2391_v51 = vld [vmem:[%s3322_s10 + $0x6] ss:$0 sm:$0xff] }
 0x540   : > { %1010 = vmatpush.msra.mxu1 %v2205_v53 }
 0x542   : > { %v865_v57 = vpop.f32.mrf.mxu0  ;;  %1011 = vmatpush.msra.mxu1 %v2204_v55 }
 0x543   : > { %v866_v59 = vadd.f32 %v2386_v54, %v865_v57  ;;  %2198 = vmatmul.msk.f32.vlgmr.msrb.gmra.mxu1 %vm418_vm0, %v2722_v52 }
 0x545   : > { %2199 = vmatpush.xpose.msk.msrb.mxu2 %vm543_vm5, %v866_v59 }
 0x548   : > { %2200 = vmatmul.msk.f32.vlgmr.msrb.gmra.mxu2 %vm543_vm5, %v836_v61 }
 0x549   : > { %1038 = vmatpush.msra.mxu2 %v2213_v60 }
 0x54b   : > { %1039 = vmatpush.msra.mxu2 %v2212_v62  ;;  %2209 = vmatmul.msk.f32.vlgmr.msra.gmra.mxu1 %vm418_vm0, %v2722_v52 }
 0x54d   : > { %1040 = vmatpush.msra.mxu2 %v2211_v63  ;;  %v2235_v63 = vld [vmem:[%s3316_s4 + $0x210] sm:$0xff] }
 0x54f   : > { %1041 = vmatpush.msra.mxu2 %v2210_v1  ;;  %v2234_v1 = vld [vmem:[%s3316_s4 + $0x208] sm:$0xff] }
 0x550   : > { %2215 = vmatmul.msk.f32.vlgmr.msra.gmra.mxu2 %vm418_vm0, %v2722_v52 }
 0x551   : > { %1158 = vmatpush.msrb.mxu2 %v2225_v5 }
 0x5b8   : > { %v782_v4 = vpop.f32.mrf.mxu1 }
 0x5b9   : > { %v806_v6 = vadd.f32 %v805_v3, %v782_v4  ;;  %v2933_v3 = vld [vmem:[%s402_s0] sm:$0xff]  ;;  %v2937_v4 = vld [vmem:[%s402_s0 + $0x8] sm:$0xff] }
 0x5c0   : > { %v895_v9 = vpop.f32.mrf.mxu1 }
 0x5c1   : > { %v896_v10 = vadd.f32 %v2387_v7, %v895_v9  ;;  %v2229_v7 = vld [vmem:[%s3316_s4 + $0x190] sm:$0xff]  ;;  %v2228_v9 = vld [vmem:[%s3316_s4 + $0x188] sm:$0xff] }
 0x5c3   : > { %955 = vmatpush.msra.mxu3 %v896_v10  ;;  %v2227_v10 = vld [vmem:[%s3316_s4 + $0x180] sm:$0xff] }
 0x5c5   : > { %1068 = vmatpush.msrb.mxu3 %v2219_v23  ;;  %v2393_v23 = vld [vmem:[%s3322_s10 + $0x3] ss:$0 sm:$0xff] }
 0x5c7   : > { %1069 = vmatpush.msrb.mxu3 %v2218_v24 }
 0x5c8   : > { %v1013_v32 = vpop.f32.mrf.mxu1 }
 0x5c9   : > { %1070 = vmatpush.msrb.mxu3 %v2217_v25  ;;  %v1014_v34 = vadd.f32 %v2388_v31, %v1013_v32  ;;  %v2255_v31 = vld [vmem:[%s3316_s4 + $0x1b8] sm:$0xff]  ;;  %v2254_v32 = vld [vmem:[%s3316_s4 + $0x1b0] sm:$0xff] }
 0x5cb   : > { %v921_v11 = vpop.f32.mrf.mxu2  ;;  %1071 = vmatpush.msrb.mxu3 %v2216_v26 }
 0x5cc   : > { %v924_v12 = vmul.f32 0.35355338, %v921_v11 }
 0x5ce   : > { %v925_v13 = vsel %vm571_vm6, %v924_v12, -1e+09 }
 0x5cf   : > { %v926_v14 = vsel %vm543_vm5, %v925_v13, -inf }
 0x5d0   : > { %927 = vmax.xlane.f32.xlu0 %v926_v14 }
 0x5d3   : > { %v1043_v16 = vpop.f32.mrf.mxu2 }
 0x5d4   : > { %v1044_v17 = vadd.f32 %v2389_v15, %v1043_v16 }
 0x5d6   : > { %2222 = vmatpush.xpose.msk.msrb.mxu0 %vm543_vm5, %v1044_v17 }
 0x643   : > { %v928_v18 = vpop.xlane.xlu0 %927 }
 0x644   : > { %v929_v19 = vsub.f32 %v925_v13, %v928_v18 }
 0x646   : > { %v930_v20 = vmul.f32 1.442695, %v929_v19 }
 0x648   : > { %2423 = vpow2.f32 %v930_v20  ;;  %v2392_v20 = vld [vmem:[%s3322_s10 + $0x2] ss:$0 sm:$0xff] }
 0x64e   : > { %v2424_v21 = vpop.eup %2423 }
 0x64f   : > { %v932_v22 = vsel %vm543_vm5, %v2424_v21, 0.0 }
 0x650   : > { %933 = vadd.xlane.f32.xlu1 %v932_v22 }
 0x6c3   : > { %v934_v27 = vpop.xlane.xlu1 %933 }
 0x6c4   : > { %2425 = vrcp.f32 %v934_v27  ;;  %v2394_v27 = vld [vmem:[%s3317_s5 + $0x10] ss:$0 sm:$0xff] }
 0x6ca   : > { %v2426_v28 = vpop.eup %2425 }
 0x6cb   : > { %v936_v29 = vmul.f32 %v2426_v28, %v2424_v21 }
 0x6cd   : > { %2201 = vmatmul.msk.f32.vlgmr.msra.gmra.mxu3 %vm543_vm5, %v936_v29 }
 0x6d5   : > { %2221 = vmatmul.msk.f32.vlgmr.msrb.gmra.mxu3 %vm418_vm0, %v2722_v52 }
 0x750   : > { %v957_v30 = vpop.f32.mrf.mxu3 }
 0x751   : > { %2203 = vmatmul.msk.f32.vlgmr.msra.gmra.mxu0 %vm543_vm5, %v957_v30 }
 0x758   : > { %v1073_v35 = vpop.f32.mrf.mxu3 }
 0x759   : > { %v1074_v36 = vadd.f32 %v2390_v33, %v1073_v35  ;;  %2223 = vmatmul.msk.f32.vlgmr.msrb.gmra.mxu0 %vm543_vm5, %v1014_v34  ;;  %v2253_v33 = vld [vmem:[%s3316_s4 + $0x1a8] sm:$0xff]  ;;  %v2252_v34 = vld [vmem:[%s3316_s4 + $0x1a0] sm:$0xff] }
 0x75a   : > { %v2395_v35 = vld [vmem:[%s3317_s5 + $0xc] ss:$0 sm:$0xff] }
 0x75b   : > { %1133 = vmatpush.msrb.mxu1 %v1074_v36 }
 0x7ce   : > { %v982_v37 = vpop.f32.mrf.mxu0 }
 0x7cf   : > { %v985_v52 = vadd.f32 %v982_v37, %v806_v6  ;;  %v2230_v6 = vld [vmem:[%s3316_s4 + $0x198] sm:$0xff] }
 0x7d0   : > { %1218 = vmatpush.msra.mxu3 %v2230_v6  ;;  %v2279_v6 = vld [vmem:[%s3316_s4 + $0x1c0] sm:$0xff] }
 0x7d2   : > { %1219 = vmatpush.msra.mxu3 %v2229_v7 }
 0x7d4   : > { %1220 = vmatpush.msra.mxu3 %v2228_v9 }
 0x7d6   : > { %v1099_v38 = vpop.f32.mrf.mxu0  ;;  %1221 = vmatpush.msra.mxu3 %v2227_v10  ;;  %v2398_v10 = vld [vmem:[%s3317_s5 + $0x11] ss:$0 sm:$0xff] }
 0x7d7   : > { %v1102_v39 = vmul.f32 0.35355338, %v1099_v38  ;;  %v2242_v38 = vld [vmem:[%s3316_s4 + $0x290] sm:$0xff] }
 0x7d9   : > { %v1103_v40 = vsel %vm571_vm6, %v1102_v39, -1e+09  ;;  %v2241_v39 = vld [vmem:[%s3316_s4 + $0x288] sm:$0xff] }
 0x7da   : > { %v1104_v41 = vsel %vm543_vm5, %v1103_v40, -inf }
 0x7db   : > { %1105 = vmax.xlane.f32.xlu2 %v1104_v41  ;;  %v3006_v41 = vld [vmem:[%s3315_s3] sm:$0xff] }
 0x7dc   : > { %vm1328_vm10 = vcmp.gt.f32.partialorder %v3006_v41, 0.0 }
 0x84e   : > { %v1106_v42 = vpop.xlane.xlu2 %1105 }
 0x84f   : > { %v1107_v43 = vsub.f32 %v1103_v40, %v1106_v42  ;;  %v2240_v40 = vld [vmem:[%s3316_s4 + $0x280] sm:$0xff] }
 0x851   : > { %v1108_v44 = vmul.f32 1.442695, %v1107_v43 }
 0x853   : > { %2427 = vpow2.f32 %v1108_v44 }
 0x859   : > { %v2428_v45 = vpop.eup %2427 }
 0x85a   : > { %v1110_v46 = vsel %vm543_vm5, %v2428_v45, 0.0 }
 0x85b   : > { %1111 = vadd.xlane.f32.xlu0 %v1110_v46 }
 0x8ce   : > { %v1112_v47 = vpop.xlane.xlu0 %1111 }
 0x8cf   : > { %2429 = vrcp.f32 %v1112_v47  ;;  %v2397_v47 = vld [vmem:[%s3317_s5 + $0x14] ss:$0 sm:$0xff] }
 0x8d5   : > { %v2430_v48 = vpop.eup %2429 }
 0x8d6   : > { %v1114_v49 = vmul.f32 %v2430_v48, %v2428_v45 }
 0x8d8   : > { %2224 = vmatmul.msk.f32.vlgmr.msrb.gmra.mxu1 %vm543_vm5, %v1114_v49 }
 0x955   : > { %v1135_v50 = vpop.f32.mrf.mxu1 }
 0x956   : > { %2226 = vmatmul.msk.f32.vlgmr.msrb.gmra.mxu2 %vm543_vm5, %v1135_v50 }
 0x9d9   : > { %v1160_v53 = vpop.f32.mrf.mxu2 }
 0x9da   : > { %v1163_v54 = vadd.f32 %v1160_v53, %v985_v52  ;;  %v2243_v52 = vld [vmem:[%s3316_s4 + $0x298] sm:$0xff] }
 0x9db   : > { %1287 = vmatpush.msra.mxu1 %v2243_v52 }
 0x9dc   : > { %v1165_v55 = vadd.f32 %v2391_v51, %v1163_v54 }
 0x9dd   : > { %1288 = vmatpush.msra.mxu1 %v2242_v38 }
 0x9de   : > { %v2910_v56 = vadd.f32 %v1165_v55, %v2629_v0  ;;  %v2236_v0 = vld [vmem:[%s3316_s4 + $0x218] sm:$0xff] }
 0x9df   : > { %1254 = vmatpush.msra.mxu0 %v2236_v0  ;;  %1289 = vmatpush.msra.mxu1 %v2241_v39  ;;  %v2251_v39 = vld [vmem:[%s3318_s6 + $0x20] sm:$0xff] }
 0x9e0   : > { %v1167_v57 = vsel %vm418_vm0, %v2910_v56, 0.0 }
 0x9e1   : > { %1168 = vadd.xlane.f32.xlu1 %v1167_v57  ;;  %1255 = vmatpush.msra.mxu0 %v2235_v63  ;;  %v2261_v57 = vld [vmem:[%s3316_s4 + $0x238] sm:$0xff] }
 0x9e2   : > { %1290 = vmatpush.msra.mxu1 %v2240_v40  ;;  %v2282_v63 = vld [vmem:[%s3316_s4 + $0x1d8] sm:$0xff] }
 0x9e3   : > { %1256 = vmatpush.msra.mxu0 %v2234_v1  ;;  %2245 = vmatmul.msk.f32.vlgmr.msra.gmra.mxu1 %vm418_vm0, %v2933_v3  ;;  %v2281_v1 = vld [vmem:[%s3316_s4 + $0x1d0] sm:$0xff] }
 0x9e5   : > { %1257 = vmatpush.msra.mxu0 %v2233_v2  ;;  %v2280_v2 = vld [vmem:[%s3316_s4 + $0x1c8] sm:$0xff] }
 0x9e6   : > { %2238 = vmatmul.msk.f32.vlgmr.msra.gmra.mxu0 %vm418_vm0, %v2933_v3 }
 0x9eb   : > { %2246 = vmatmul.msk.f32.gmra.mxu1 %vm418_vm0, %v2937_v4 }
 0x9ee   : > { %2239 = vmatmul.msk.f32.gmra.mxu0 %vm418_vm0, %v2937_v4 }
 0xa54   : > { %v1169_v58 = vpop.xlane.xlu1 %1168 }
 0xa55   : > { %v1170_v59 = vmul.f32 %v1169_v58, %v2633_v8  ;;  %v2260_v58 = vld [vmem:[%s3316_s4 + $0x230] sm:$0xff] }
 0xa57   : > { %v1171_v60 = vsub.f32 %v2910_v56, %v1170_v59  ;;  %v2259_v59 = vld [vmem:[%s3316_s4 + $0x228] sm:$0xff] }
 0xa59   : > { %v1172_v61 = vmul.f32 %v1171_v60, %v1171_v60 }
 0xa5b   : > { %v1173_v62 = vsel %vm418_vm0, %v1172_v61, 0.0 }
 0xa5c   : > { %1174 = vadd.xlane.f32.xlu2 %v1173_v62 }
 0xa60   : > { %v1292_v46 = vpop.f32.mrf.mxu1 }
 0xa61   : > { %v1293_v49 = vadd.f32 %v2397_v47, %v1292_v46 }
 0xa63   : > { %v1259_v26 = vpop.f32.mrf.mxu0 }
 0xa64   : > { %v1260_v30 = vadd.f32 %v2394_v27, %v1259_v26 }
 0xa68   : > { %v1295_v48 = vpop.f32.mrf.mxu1 }
 0xa69   : > { %v1296_v5 = vadd.f32 %v2397_v47, %v1295_v48 }
 0xa6b   : > { %v1262_v28 = vpop.f32.mrf.mxu0  ;;  %1359 = vmatpush.msrb.mxu3 %v1296_v5 }
 0xa6c   : > { %v1263_v29 = vadd.f32 %v2394_v27, %v1262_v28  ;;  %v2287_v27 = vld [vmem:[%s3316_s4 + $0x250] sm:$0xff]  ;;  %v2286_v28 = vld [vmem:[%s3316_s4 + $0x248] sm:$0xff] }
 0xa6d   : > { %1360 = vmatpush.msrb.mxu3 %v1293_v49  ;;  %v2399_v49 = vld [vmem:[%s3317_s5 + $0xe] ss:$0 sm:$0xff] }
 0xa6e   : > { %2247 = vmatpush.xpose.msk.msra.mxu2 %vm543_vm5, %v1263_v29  ;;  %v2285_v29 = vld [vmem:[%s3316_s4 + $0x240] sm:$0xff] }
 0xa72   : > { %2248 = vmatpush.xpose.msk.msra.mxu2 %vm543_vm5, %v1260_v30 }
 0xa76   : > { %1389 = vmatpush.msrb.mxu2 %v2255_v31  ;;  %v2400_v31 = vld [vmem:[%s3317_s5 + $0x15] ss:$0 sm:$0xff] }
 0xa78   : > { %1390 = vmatpush.msrb.mxu2 %v2254_v32 }
 0xa7a   : > { %1391 = vmatpush.msrb.mxu2 %v2253_v33 }
 0xa7c   : > { %1392 = vmatpush.msrb.mxu2 %v2252_v34 }
 0xacf   : > { %v1175_v11 = vpop.xlane.xlu2 %1174 }
 0xad0   : > { %v1176_v12 = vmul.f32 %v1175_v11, %v2633_v8 }
 0xad2   : > { %v1177_v13 = vadd.f32 1e-05, %v1176_v12 }
 0xad4   : > { %2431 = vrsqrt.f32 %v1177_v13  ;;  %vm1184_vm8 = vweird.f32 %v1177_v13 }
 0xada   : > { %v2432_v14 = vpop.eup %2431 }
 0xadb   : > { %v1179_v15 = vmul.f32 %v2432_v14, %v1177_v13  ;;  %vm1185_vm7 = vweird.f32 %v2432_v14  ;;  %v2396_v13 = vld [vmem:[%s3317_s5 + $0xd] ss:$0 sm:$0xff] }
 0xadc   : > { %vm1186_vm9 = vmor %vm1184_vm8, %vm1185_vm7 }
 0xadd   : > { %v1180_v16 = vmul.f32 %v2432_v14, %v1179_v15 }
 0xadf   : > { %v1181_v17 = vmul.f32 0.5, %v1180_v16 }
 0xae1   : > { %v1182_v18 = vsub.f32 1.5, %v1181_v17  ;;  %v2268_v17 = vld [vmem:[%s3316_s4 + $0x2b8] sm:$0xff] }
 0xae2   : > { %1452 = vmatpush.msrb.mxu0 %v2268_v17 }
 0xae3   : > { %v1183_v19 = vmul.f32 %v2432_v14, %v1182_v18  ;;  %v2267_v18 = vld [vmem:[%s3316_s4 + $0x2b0] sm:$0xff] }
 0xae4   : > { %1453 = vmatpush.msrb.mxu0 %v2267_v18  ;;  %v2311_v18 = vld [vmem:[%s3316_s4 + $0x260] sm:$0xff] }
 0xae5   : > { %v1187_v21 = vsel %vm1186_vm9, %v2432_v14, %v1183_v19  ;;  %v2266_v19 = vld [vmem:[%s3316_s4 + $0x2a8] sm:$0xff] }
 0xae6   : > { %v1188_v22 = vmul.f32 %v1187_v21, %v1171_v60  ;;  %v2258_v60 = vld [vmem:[%s3316_s4 + $0x220] sm:$0xff]  ;;  %1454 = vmatpush.msrb.mxu0 %v2266_v19  ;;  %v2288_v21 = vld [vmem:[%s3316_s4 + $0x258] sm:$0xff] }
 0xae7   : > { %v2308_v19 = vld [vmem:[%s3316_s4 + $0x1f8] sm:$0xff] }
 0xae8   : > { %v1190_v24 = vmul.f32 %v2392_v20, %v1188_v22  ;;  %v2265_v20 = vld [vmem:[%s3316_s4 + $0x2a0] sm:$0xff] }
 0xae9   : > { %1455 = vmatpush.msrb.mxu0 %v2265_v20  ;;  %v2307_v20 = vld [vmem:[%s3316_s4 + $0x1f0] sm:$0xff] }
 0xaea   : > { %v2960_v25 = vadd.f32 %v2393_v23, %v1190_v24  ;;  %2270 = vmatmul.msk.f32.vlgmr.msrb.gmra.mxu0 %vm418_vm0, %v2933_v3 }
 0xaeb   : > { %1628 = vmatpush.msra.mxu0 %v2288_v21  ;;  %v2306_v21 = vld [vmem:[%s3316_s4 + $0x1e8] sm:$0xff] }
 0xaec   : > { %2232 = vmatmul.msk.f32.vlgmr.msra.gmra.mxu3 %vm418_vm0, %v2960_v25 }
 0xaed   : > { %1419 = vmatpush.msra.mxu3 %v2261_v57  ;;  %1629 = vmatpush.msra.mxu0 %v2287_v27  ;;  %v2303_v27 = vld [vmem:[%s3318_s6 + $0x30] sm:$0xff] }
 0xaef   : > { %1420 = vmatpush.msra.mxu3 %v2260_v58  ;;  %1630 = vmatpush.msra.mxu0 %v2286_v28 }
 0xaf1   : > { %1421 = vmatpush.msra.mxu3 %v2259_v59  ;;  %1631 = vmatpush.msra.mxu0 %v2285_v29  ;;  %v2403_v29 = vld [vmem:[%s3317_s5 + $0x13] ss:$0 sm:$0xff] }
 0xaf2   : > { %2271 = vmatmul.msk.f32.gmra.mxu0 %vm418_vm0, %v2937_v4 }
 0xaf3   : > { %1422 = vmatpush.msra.mxu3 %v2258_v60 }
 0xafa   : > { %2290 = vmatmul.msk.f32.vlgmr.msra.gmra.mxu0 %vm418_vm0, %v2933_v3 }
 0xb02   : > { %2291 = vmatmul.msk.f32.gmra.mxu0 %vm418_vm0, %v2937_v4 }
 0xb67   : > { %v1457_v30 = vpop.f32.mrf.mxu0 }
 0xb68   : > { %v1458_v33 = vadd.f32 %v2400_v31, %v1457_v30 }
 0xb6f   : > { %v1223_v36 = vpop.f32.mrf.mxu3  ;;  %v1460_v32 = vpop.f32.mrf.mxu0 }
 0xb70   : > { %v1224_v37 = vadd.f32 %v2395_v35, %v1223_v36  ;;  %v1461_v34 = vadd.f32 %v2400_v31, %v1460_v32 }
 0xb72   : > { %2249 = vmatmul.msk.f32.vlgmr.msra.gmra.mxu2 %vm543_vm5, %v1224_v37 }
 0xb73   : > { %1522 = vmatpush.msra.mxu2 %v1461_v34 }
 0xb75   : > { %1523 = vmatpush.msra.mxu2 %v1458_v33 }
 0xb77   : > { %v1633_v40 = vpop.f32.mrf.mxu0 }
 0xb7a   : > { %2257 = vmatmul.msk.f32.vlgmr.msrb.gmra.mxu2 %vm418_vm0, %v2960_v25 }
 0xb7b   : > { %1571 = vmatpush.msrb.mxu2 %v2251_v39 }
 0xbf5   : > { %v1324_v42 = vpop.f32.mrf.mxu2 }
 0xbf6   : > { %v1327_v43 = vmul.f32 0.35355338, %v1324_v42 }
 0xbf8   : > { %v1329_v44 = vsel %vm1328_vm10, %v1327_v43, -1e+09  ;;  %v2401_v43 = vld [vmem:[%s3317_s5 + $0x12] ss:$0 sm:$0xff] }
 0xbf9   : > { %v1331_v45 = vsel %vm1330_vm11, %v1329_v44, -inf  ;;  %v1634_v48 = vadd.f32 %v2401_v43, %v1633_v40 }
 0xbfa   : > { %1332 = vmax.xlane.f32.xlu0 %v1331_v45 }
 0xbfd   : > { %v1394_v14 = vpop.f32.mrf.mxu2 }
 0xbfe   : > { %v1395_v16 = vadd.f32 %v2396_v13, %v1394_v14  ;;  %v2402_v13 = vld [vmem:[%s3317_s5 + $0x16] ss:$0 sm:$0xff]  ;;  %v2312_v14 = vld [vmem:[%s3316_s4 + $0x268] sm:$0xff] }
 0xc6d   : > { %v1333_v50 = vpop.xlane.xlu0 %1332 }
 0xc6e   : > { %v1334_v51 = vsub.f32 %v1329_v44, %v1333_v50  ;;  %v1636_v44 = vpop.f32.mrf.mxu0 }
 0xc6f   : > { %v1637_v46 = vadd.f32 %v2401_v43, %v1636_v44 }
 0xc70   : > { %v1335_v53 = vmul.f32 1.442695, %v1334_v51  ;;  %v2276_v51 = vld [vmem:[%s3318_s6 + $0x28] sm:$0xff] }
 0xc72   : > { %2433 = vpow2.f32 %v1335_v53  ;;  %v2295_v53 = vld [vmem:[%s3316_s4 + $0x2d8] sm:$0xff] }
 0xc78   : > { %v2434_v54 = vpop.eup %2433 }
 0xc79   : > { %v1337_v55 = vsel %vm1330_vm11, %v2434_v54, 0.0 }
 0xc7a   : > { %1338 = vadd.xlane.f32.xlu1 %v1337_v55 }
 0xced   : > { %v1339_v61 = vpop.xlane.xlu1 %1338 }
 0xcee   : > { %2435 = vrcp.f32 %v1339_v61 }
 0xcf4   : > { %v2436_v62 = vpop.eup %2435 }
 0xcf5   : > { %v1341_v0 = vmul.f32 %v2436_v62, %v2434_v54  ;;  %v2294_v54 = vld [vmem:[%s3316_s4 + $0x2d0] sm:$0xff]  ;;  %v2293_v62 = vld [vmem:[%s3316_s4 + $0x2c8] sm:$0xff] }
 0xcf7   : > { %2250 = vmatmul.msk.f32.vlgmr.msrb.gmra.mxu3 %vm1330_vm11, %v1341_v0  ;;  %v2292_v0 = vld [vmem:[%s3316_s4 + $0x2c0] sm:$0xff] }
 0xcf8   : > { %1598 = vmatpush.msrb.mxu3 %v2282_v63 }
 0xcfa   : > { %1599 = vmatpush.msrb.mxu3 %v2281_v1 }
 0xcfc   : > { %1600 = vmatpush.msrb.mxu3 %v2280_v2 }
 0xcfe   : > { %1601 = vmatpush.msrb.mxu3 %v2279_v6 }
 0xcff   : > { %2263 = vmatmul.msk.f32.vlgmr.msra.gmra.mxu3 %vm418_vm0, %v2933_v3 }
 0xd07   : > { %2264 = vmatmul.msk.f32.gmra.mxu3 %vm418_vm0, %v2937_v4 }
 0xd0f   : > { %2284 = vmatmul.msk.f32.vlgmr.msrb.gmra.mxu3 %vm418_vm0, %v2960_v25 }
 0xd7a   : > { %v3047_v7 = vpop.f32.mrf.mxu3 }
 0xd82   : > { %v1424_v9 = vpop.f32.mrf.mxu3 }
 0xd83   : > { %v1425_v15 = vadd.f32 %v2398_v10, %v1424_v9  ;;  %v2314_v9 = vld [vmem:[%s3316_s4 + $0x278] sm:$0xff] }
 0xd84   : > { %1815 = vmatpush.msrb.mxu0 %v2314_v9 }
 0xd8a   : > { %v1427_v11 = vpop.f32.mrf.mxu3 }
 0xd8b   : > { %v1428_v12 = vadd.f32 %v2398_v10, %v1427_v11  ;;  %v2313_v10 = vld [vmem:[%s3316_s4 + $0x270] sm:$0xff] }
 0xd8c   : > { %1816 = vmatpush.msrb.mxu0 %v2313_v10 }
 0xd8d   : > { %2272 = vmatpush.xpose.msk.msrb.mxu1 %vm543_vm5, %v1428_v12 }
 0xd8e   : > { %1817 = vmatpush.msrb.mxu0 %v2312_v14  ;;  %v2018_v14 = vld [vmem:[%s3321_s9 + $0x38] sm:$0xff] }
 0xd90   : > { %1818 = vmatpush.msrb.mxu0 %v2311_v18 }
 0xd91   : > { %2273 = vmatpush.xpose.msk.msrb.mxu1 %vm543_vm5, %v1425_v15  ;;  %2316 = vmatmul.msk.f32.vlgmr.msrb.gmra.mxu0 %vm418_vm0, %v2933_v3 }
 0xd92   : > { %v1603_v5 = vpop.f32.mrf.mxu3  ;;  %2032 = vmatpush.msra.mxu0 %v2018_v14 }
 0xd93   : > { %v1604_v50 = vadd.f32 %v2399_v49, %v1603_v5 }
 0xd94   : > { %2274 = vmatmul.msk.f32.vlgmr.msrb.gmra.mxu1 %vm543_vm5, %v1395_v16 }
 0xd95   : > { %1548 = vmatpush.msra.mxu1 %v2276_v51 }
 0xd97   : > { %1661 = vmatpush.msrb.mxu1 %v2295_v53 }
 0xd99   : > { %1662 = vmatpush.msrb.mxu1 %v2294_v54  ;;  %2317 = vmatmul.msk.f32.gmra.mxu0 %vm418_vm0, %v2937_v4 }
 0xd9b   : > { %1663 = vmatpush.msrb.mxu1 %v2293_v62 }
 0xd9d   : > { %1664 = vmatpush.msrb.mxu1 %v2292_v0 }
 0xe0e   : > { %v1820_v28 = vpop.f32.mrf.mxu0 }
 0xe0f   : > { %v1821_v32 = vadd.f32 %v2403_v29, %v1820_v28  ;;  %v2407_v28 = vld [vmem:[%s3322_s10 + $0x4] ss:$0 sm:$0xff] }
 0xe11   : > { %v1489_v22 = vpop.f32.mrf.mxu1 }
 0xe12   : > { %v1492_v23 = vmul.f32 0.35355338, %v1489_v22  ;;  %v2305_v22 = vld [vmem:[%s3316_s4 + $0x1e0] sm:$0xff] }
 0xe14   : > { %v1493_v24 = vsel %vm1328_vm10, %v1492_v23, -1e+09 }
 0xe15   : > { %v1494_v26 = vsel %vm1330_vm11, %v1493_v24, -inf }
 0xe16   : > { %1495 = vmax.xlane.f32.xlu2 %v1494_v26  ;;  %v1823_v30 = vpop.f32.mrf.mxu0 }
 0xe17   : > { %v1824_v31 = vadd.f32 %v2403_v29, %v1823_v30 }
 0xe89   : > { %v1496_v35 = vpop.xlane.xlu2 %1495 }
 0xe8a   : > { %v1497_v36 = vsub.f32 %v1493_v24, %v1496_v35 }
 0xe8c   : > { %v1498_v37 = vmul.f32 1.442695, %v1497_v36  ;;  %v2321_v36 = vld [vmem:[%s3316_s4 + $0x2f8] sm:$0xff] }
 0xe8e   : > { %2437 = vpow2.f32 %v1498_v37  ;;  %v2320_v37 = vld [vmem:[%s3316_s4 + $0x2f0] sm:$0xff] }
 0xe94   : > { %v2438_v52 = vpop.eup %2437 }
 0xe95   : > { %v1500_v38 = vsel %vm1330_vm11, %v2438_v52, 0.0 }
 0xe96   : > { %1501 = vadd.xlane.f32.xlu0 %v1500_v38  ;;  %v2318_v38 = vld [vmem:[%s3316_s4 + $0x2e0] sm:$0xff] }
 0xf09   : > { %v1502_v42 = vpop.xlane.xlu0 %1501 }
 0xf0a   : > { %2439 = vrcp.f32 %v1502_v42 }
 0xf10   : > { %v2440_v45 = vpop.eup %2439 }
 0xf11   : > { %v1504_v47 = vmul.f32 %v2440_v45, %v2438_v52  ;;  %v2319_v52 = vld [vmem:[%s3316_s4 + $0x2e8] sm:$0xff] }
 0xf13   : > { %2275 = vmatmul.msk.f32.vlgmr.msra.gmra.mxu2 %vm1330_vm11, %v1504_v47 }
 0xf14   : > { %2299 = vmatpush.xpose.msk.msra.mxu2 %vm543_vm5, %v1637_v46  ;;  %v2405_v46 = vld [vmem:[%s3317_s5 + $0x17] ss:$0 sm:$0xff] }
 0xf18   : > { %2300 = vmatpush.xpose.msk.msra.mxu2 %vm543_vm5, %v1634_v48 }
 0xf1b   : > { %2278 = vmatmul.msk.f32.vlgmr.msrb.gmra.mxu2 %vm543_vm5, %v3047_v7 }
 0xf1c   : > { %1757 = vmatpush.msrb.mxu2 %v2303_v27 }
 0xf23   : > { %2301 = vmatmul.msk.f32.vlgmr.msra.gmra.mxu2 %vm543_vm5, %v1604_v50 }
 0xf24   : > { %2325 = vmatpush.xpose.msk.msra.mxu2 %vm543_vm5, %v1824_v31  ;;  %v2408_v31 = vld [vmem:[%s3322_s10 + $0x5] ss:$0 sm:$0xff] }
 0xf28   : > { %2326 = vmatpush.xpose.msk.msra.mxu2 %vm543_vm5, %v1821_v32 }
 0xf96   : > { %v1525_v55 = vpop.f32.mrf.mxu2 }
 0xf97   : > { %2277 = vmatmul.msk.f32.vlgmr.msra.gmra.mxu1 %vm543_vm5, %v1525_v55  ;;  %v2329_v55 = vld [vmem:[%s3318_s6 + $0x38] sm:$0xff] }
 0xf98   : > { %1848 = vmatpush.msra.mxu1 %v2321_v36  ;;  %v2409_v36 = vld [vmem:[%s3320_s8] ss:$0 sm:$0xff] }
 0xf9a   : > { %1849 = vmatpush.msra.mxu1 %v2320_v37 }
 0xf9c   : > { %1850 = vmatpush.msra.mxu1 %v2319_v52 }
 0xf9e   : > { %v3122_v57 = vpop.f32.mrf.mxu2  ;;  %1851 = vmatpush.msra.mxu1 %v2318_v38 }
 0xf9f   : > { %2297 = vmatmul.msk.f32.vlgmr.msrb.gmra.mxu1 %vm418_vm0, %v2933_v3 }
 0xfa6   : > { %v1698_v58 = vpop.f32.mrf.mxu2 }
 0xfa7   : > { %v1701_v59 = vmul.f32 0.35355338, %v1698_v58  ;;  %2298 = vmatmul.msk.f32.gmra.mxu1 %vm418_vm0, %v2937_v4 }
 0xfa9   : > { %v1702_v60 = vsel %vm1328_vm10, %v1701_v59, -1e+09 }
 0xfaa   : > { %v1703_v61 = vsel %vm1330_vm11, %v1702_v60, -inf }
 0xfab   : > { %1704 = vmax.xlane.f32.xlu1 %v1703_v61  ;;  %v2406_v61 = vld [vmem:[%s3322_s10 + $0x7] ss:$0 sm:$0xff] }
 0xfaf   : > { %2323 = vmatmul.msk.f32.vlgmr.msra.gmra.mxu1 %vm418_vm0, %v2933_v3 }
 0xfb7   : > { %2324 = vmatmul.msk.f32.gmra.mxu1 %vm418_vm0, %v2937_v4 }
0x1014   : > { %v3144_v11 = vpop.f32.mrf.mxu1 }
0x1015   : > { %v1574_v59 = vadd.f32 %v3122_v57, %v3144_v11  ;;  %v1982_v11 = vld [vmem:[%s3319_s7 + $0x18] sm:$0xff] }
0x101c   : > { %v1666_v12 = vpop.f32.mrf.mxu1 }
0x101d   : > { %v1667_v16 = vadd.f32 %v2402_v13, %v1666_v12  ;;  %v1980_v12 = vld [vmem:[%s3319_s7 + $0x8] sm:$0xff] }
0x101e   : > { %v1705_v63 = vpop.xlane.xlu1 %1704 }
0x101f   : > { %v1706_v1 = vsub.f32 %v1702_v60, %v1705_v63 }
0x1021   : > { %v1707_v2 = vmul.f32 1.442695, %v1706_v1 }
0x1023   : > { %2441 = vpow2.f32 %v1707_v2 }
0x1024   : > { %v1669_v15 = vpop.f32.mrf.mxu1 }
0x1025   : > { %v1670_v17 = vadd.f32 %v2402_v13, %v1669_v15  ;;  %v1979_v13 = vld [vmem:[%s3319_s7] sm:$0xff]  ;;  %v2017_v15 = vld [vmem:[%s3321_s9 + $0x30] sm:$0xff] }
0x1026   : > { %2033 = vmatpush.msra.mxu0 %v2017_v15 }
0x1027   : > { %1731 = vmatpush.msra.mxu3 %v1670_v17 }
0x1029   : > { %v2442_v6 = vpop.eup %2441  ;;  %1732 = vmatpush.msra.mxu3 %v1667_v16  ;;  %v2016_v16 = vld [vmem:[%s3321_s9 + $0x28] sm:$0xff] }
0x102a   : > { %v1709_v7 = vsel %vm1330_vm11, %v2442_v6, 0.0  ;;  %2034 = vmatpush.msra.mxu0 %v2016_v16 }
0x102b   : > { %1710 = vadd.xlane.f32.xlu2 %v1709_v7  ;;  %1785 = vmatpush.msrb.mxu3 %v2308_v19  ;;  %v2015_v19 = vld [vmem:[%s3321_s9 + $0x20] sm:$0xff] }
0x102c   : > { %v1853_v45 = vpop.f32.mrf.mxu1  ;;  %2035 = vmatpush.msra.mxu0 %v2015_v19 }
0x102d   : > { %1786 = vmatpush.msrb.mxu3 %v2307_v20  ;;  %v1854_v48 = vadd.f32 %v2405_v46, %v1853_v45 }
0x102f   : > { %1787 = vmatpush.msrb.mxu3 %v2306_v21  ;;  %v2014_v21 = vld [vmem:[%s3321_s9 + $0x18] sm:$0xff] }
0x1030   : > { %2036 = vmatpush.msra.mxu0 %v2014_v21 }
0x1031   : > { %1788 = vmatpush.msrb.mxu3 %v2305_v22 }
0x1034   : > { %v1856_v47 = vpop.f32.mrf.mxu1 }
0x1035   : > { %v1857_v3 = vadd.f32 %v2405_v46, %v1856_v47 }
0x109e   : > { %v1711_v23 = vpop.xlane.xlu2 %1710 }
0x109f   : > { %2443 = vrcp.f32 %v1711_v23 }
0x10a5   : > { %v2444_v24 = vpop.eup %2443 }
0x10a6   : > { %v1713_v26 = vmul.f32 %v2444_v24, %v2442_v6 }
0x10a8   : > { %2302 = vmatmul.msk.f32.vlgmr.msra.gmra.mxu3 %vm1330_vm11, %v1713_v26 }
0x10a9   : > { %1918 = vmatpush.msra.mxu3 %v1857_v3 }
0x10ab   : > { %1919 = vmatpush.msra.mxu3 %v1854_v48 }
0x10b0   : > { %2310 = vmatmul.msk.f32.vlgmr.msrb.gmra.mxu3 %vm418_vm0, %v2960_v25  ;;  %v2404_v25 = vld [vmem:[%s3317_s5 + $0xf] ss:$0 sm:$0xff] }
0x10b1   : > { %2002 = vmatpush.msrb.mxu3 %v1982_v11 }
0x112b   : > { %v1734_v33 = vpop.f32.mrf.mxu3 }
0x112c   : > { %2304 = vmatmul.msk.f32.vlgmr.msrb.gmra.mxu2 %vm543_vm5, %v1734_v33 }
0x112d   : > { %1944 = vmatpush.msrb.mxu2 %v2329_v55 }
0x1133   : > { %v1790_v34 = vpop.f32.mrf.mxu3 }
0x1134   : > { %v1791_v35 = vadd.f32 %v2404_v25, %v1790_v34  ;;  %v2013_v25 = vld [vmem:[%s3321_s9 + $0x10] sm:$0xff]  ;;  %v2012_v34 = vld [vmem:[%s3321_s9 + $0x8] sm:$0xff] }
0x1135   : > { %2037 = vmatpush.msra.mxu0 %v2013_v25 }
0x1136   : > { %2327 = vmatmul.msk.f32.vlgmr.msra.gmra.mxu2 %vm543_vm5, %v1791_v35  ;;  %v2011_v35 = vld [vmem:[%s3321_s9] sm:$0xff] }
0x1137   : > { %2038 = vmatpush.msra.mxu0 %v2012_v34 }
0x1139   : > { %2039 = vmatpush.msra.mxu0 %v2011_v35 }
0x11af   : > { %v1759_v39 = vpop.f32.mrf.mxu2 }
0x11b0   : > { %v1762_v60 = vadd.f32 %v1759_v39, %v1574_v59  ;;  %v2410_v39 = vld [vmem:[%s3322_s10 + $0x8] ss:$0 sm:$0xff] }
0x11b9   : > { %v1885_v40 = vpop.f32.mrf.mxu2 }
0x11ba   : > { %v1888_v42 = vmul.f32 0.35355338, %v1885_v40 }
0x11bc   : > { %v1889_v43 = vsel %vm1328_vm10, %v1888_v42, -1e+09 }
0x11bd   : > { %v1890_v44 = vsel %vm1330_vm11, %v1889_v43, -inf }
0x11be   : > { %1891 = vmax.xlane.f32.xlu0 %v1890_v44 }
0x1231   : > { %v1892_v4 = vpop.xlane.xlu0 %1891 }
0x1232   : > { %v1893_v49 = vsub.f32 %v1889_v43, %v1892_v4 }
0x1234   : > { %v1894_v5 = vmul.f32 1.442695, %v1893_v49 }
0x1236   : > { %2445 = vpow2.f32 %v1894_v5 }
0x123c   : > { %v2446_v50 = vpop.eup %2445 }
0x123d   : > { %v1896_v41 = vsel %vm1330_vm11, %v2446_v50, 0.0 }
0x123e   : > { %1897 = vadd.xlane.f32.xlu1 %v1896_v41 }
0x12b1   : > { %v1898_v51 = vpop.xlane.xlu1 %1897 }
0x12b2   : > { %2447 = vrcp.f32 %v1898_v51 }
0x12b8   : > { %v2448_v53 = vpop.eup %2447 }
0x12b9   : > { %v1900_v54 = vmul.f32 %v2448_v53, %v2446_v50 }
0x12bb   : > { %2328 = vmatmul.msk.f32.vlgmr.msra.gmra.mxu3 %vm1330_vm11, %v1900_v54 }
0x133e   : > { %v1921_v58 = vpop.f32.mrf.mxu3 }
0x133f   : > { %2330 = vmatmul.msk.f32.vlgmr.msrb.gmra.mxu2 %vm543_vm5, %v1921_v58 }
0x13c2   : > { %v1946_v62 = vpop.f32.mrf.mxu2 }
0x13c3   : > { %v1949_v0 = vadd.f32 %v1946_v62, %v1762_v60 }
0x13c5   : > { %v1951_v63 = vadd.f32 %v2406_v61, %v1949_v0 }
0x13c7   : > { %v3221_v1 = vadd.f32 %v1951_v63, %v2910_v56  ;;  %v1981_v56 = vld [vmem:[%s3319_s7 + $0x10] sm:$0xff] }
0x13c8   : > { %2003 = vmatpush.msrb.mxu3 %v1981_v56 }
0x13c9   : > { %v1953_v2 = vsel %vm418_vm0, %v3221_v1, 0.0 }
0x13ca   : > { %1954 = vadd.xlane.f32.xlu2 %v1953_v2  ;;  %2004 = vmatpush.msrb.mxu3 %v1980_v12 }
0x13cc   : > { %2005 = vmatpush.msrb.mxu3 %v1979_v13 }
0x143d   : > { %v1955_v6 = vpop.xlane.xlu2 %1954 }
0x143e   : > { %v1956_v7 = vmul.f32 %v1955_v6, %v2633_v8 }
0x1440   : > { %v1957_v57 = vsub.f32 %v3221_v1, %v1956_v7 }
0x1442   : > { %v1958_v9 = vmul.f32 %v1957_v57, %v1957_v57 }
0x1444   : > { %v1959_v10 = vsel %vm418_vm0, %v1958_v9, 0.0 }
0x1445   : > { %1960 = vadd.xlane.f32.xlu0 %v1959_v10 }
0x14b8   : > { %v1961_v17 = vpop.xlane.xlu0 %1960 }
0x14b9   : > { %v1962_v18 = vmul.f32 %v1961_v17, %v2633_v8 }
0x14bb   : > { %v1963_v20 = vadd.f32 1e-05, %v1962_v18 }
0x14bd   : > { %2449 = vrsqrt.f32 %v1963_v20  ;;  %vm1970_vm13 = vweird.f32 %v1963_v20 }
0x14c3   : > { %v2450_v22 = vpop.eup %2449 }
0x14c4   : > { %v1965_v23 = vmul.f32 %v2450_v22, %v1963_v20  ;;  %vm1971_vm12 = vweird.f32 %v2450_v22 }
0x14c5   : > { %vm1972_vm14 = vmor %vm1970_vm13, %vm1971_vm12 }
0x14c6   : > { %v1966_v24 = vmul.f32 %v2450_v22, %v1965_v23 }
0x14c8   : > { %v1967_v26 = vmul.f32 0.5, %v1966_v24 }
0x14ca   : > { %v1968_v27 = vsub.f32 1.5, %v1967_v26 }
0x14cc   : > { %v1969_v8 = vmul.f32 %v2450_v22, %v1968_v27 }
0x14ce   : > { %v1973_v29 = vsel %vm1972_vm14, %v2450_v22, %v1969_v8 }
0x14cf   : > { %v1974_v30 = vmul.f32 %v1973_v29, %v1957_v57 }
0x14d1   : > { %v1976_v32 = vmul.f32 %v2407_v28, %v1974_v30 }
0x14d3   : > { %v1978_v33 = vadd.f32 %v2408_v31, %v1976_v32 }
0x14d5   : > { %2331 = vmatmul.msk.f32.vlgmr.msrb.gmra.mxu3 %vm418_vm0, %v1978_v33 }
0x1558   : > { %v2007_v37 = vpop.f32.mrf.mxu3 }
0x1559   : > { %v2008_v52 = vadd.f32 %v2409_v36, %v2007_v37 }
0x155b   : > { %v2010_v38 = vmax.f32 %v2008_v52, 0.0 }
0x155d   : > { %2332 = vmatmul.msk.f32.vlgmr.msra.gmra.mxu0 %vm2020_vm15, %v2010_v38 }
0x15da   : > { %v2041_v40 = vpop.f32.mrf.mxu0 }
0x15db   : > { %v2042_v42 = vadd.f32 %v2410_v39, %v2041_v40 }
0x15dd   : > { %v2044_v43 = vadd.f32 %v2042_v42, %v3221_v1 }
0x15df   : > { %2045 = vst.msk [vmem:[%s393_s24] sm:$0xff] %vm418_vm0, %v2044_v43 }
0x15e0   : > { %2478 = shalt.err (!%p2475_p4)
}
0x15e1   : > { %2337 = dma.vmem_to_hbm [thread:$0]  (%p2614_p5), %s2060_s25, 128, %s2062_s29, %s2047_s21  }
0x15e2 PF: > { %p2343_p7 = scmp.ge.s32.totalorder %s2513_s20, 2  ;;  %s2073_s13 = sand.u32 1, %s2501_s17  }
0x15e3   : > { %s2074_s16 = scalar_lea.sflag [#allocation3], %s2073_s13 }
0x15e4   : > { %p2340_p8 = pnand %p2343_p7, %p2618_p6 }
0x15e6   : > { %p2341_p9 = pneg %p2340_p8 }
0x15e8   : > { %2496 = dma.done.wait (%p2341_p9), %s2074_s16, 128  }
0x15e9   : > { %2498 = vsyncadd (%p2341_p9), %s2074_s16, 4294967168  ;;  %s3331_s22 = sld [smem:[#allocation5_spill]]  ;;  %p21_p10 = scmp.ge.s32.totalorder %s2601_s23, 4  }
0x15ea   : > { %s3332_s17 = smov %s2505_s18  ;;  %s3333_s18 = smov %s2509_s19 }
0x15eb   : > { %s3335_s20 = smov %s2601_s23  ;;  %23 = sbr.rel (!%p21_p10) target bundleno = 6 (0x6), region = 155 }
0x15ef   : > { %s3334_s19 = smov %s3331_s22 }
0x15f0   :  { %2080 = vsyncpa [#allocation3], 1 }
0x15f1   :  { %2082 = vsyncpa [#allocation3 + $0x1], 1 }

</bundles_post_ra>
